<compile_context>
chip_gen: v6e
topology: v6e:2x2x1
jax: 0.10.0
libtpu: 0.0.40
codegen_flags: <defaults>
</compile_context>

<pallas_src>
import jax
import jax.numpy as jnp
from jax.experimental import pallas as pl
from jax.experimental.pallas import tpu as pltpu


def _gated_conv1x1_kernel(g_ref, x_ref, w_ref, o_ref):
    # g_ref: (C_in, 1)          pre-sigmoid per-channel gate
    # x_ref: (C_in, HW)         activations, channels on sublanes (native NCHW collapse)
    # w_ref: (C_out_blk, C_in)  conv weight, native PyTorch (C_out, C_in) orientation
    # o_ref: (C_out_blk, HW)
    g = jax.nn.sigmoid(g_ref[...])                     # f32 sigmoid on the EUP
    xg = x_ref[...] * g                                # f32 VPU mul, lane-broadcast of (C_in,1)
    xg_bf = xg.astype(jnp.bfloat16)                    # bf16 MXU operands, f32 accumulation
    w_bf = w_ref[...].astype(jnp.bfloat16)
    acc = jnp.dot(w_bf, xg_bf, preferred_element_type=jnp.float32)
    o_ref[...] = acc.astype(o_ref.dtype)


def sigmoid_mul_conv1x1(x211, x215, weight, *, cout_blocks=2):
    """
    x211:   (N, C_in, H, W)      NCHW, like PyTorch
    x215:   (N, C_in, 1, 1)      gate (pre-sigmoid)
    weight: (C_out, C_in, 1, 1)  PyTorch Conv2d weight layout
    returns (N, C_out, H, W)
    """
    N, C_in, H, W = x211.shape
    C_out = weight.shape[0]
    # TODO(synk): N > 1 would need the batch as a grid axis; module uses N == 1.
    assert N == 1, "this synthetic module uses batch 1"
    HW = H * W

    # Pure views -- no transposes / copies outside the kernel.
    x_mat = x211.reshape(C_in, HW)          # (1152, 49)
    g_col = x215.reshape(C_in, 1)           # (1152, 1)
    w_mat = weight.reshape(C_out, C_in)     # (192, 1152), native orientation (no .T)

    assert C_out % cout_blocks == 0
    c_blk = C_out // cout_blocks
    assert c_blk % 8 == 0, "C_out block must stay sublane-aligned"

    out_mat = pl.pallas_call(
        _gated_conv1x1_kernel,
        out_shape=jax.ShapeDtypeStruct((C_out, HW), x211.dtype),
        grid_spec=pltpu.PrefetchScalarGridSpec(
            num_scalar_prefetch=0,
            grid=(cout_blocks,),
            in_specs=[
                pl.BlockSpec((C_in, 1), lambda i: (0, 0)),       # gate (resident)
                pl.BlockSpec((C_in, HW), lambda i: (0, 0)),      # x    (resident)
                pl.BlockSpec((c_blk, C_in), lambda i: (i, 0)),   # weight slab per step
            ],
            out_specs=pl.BlockSpec((c_blk, HW), lambda i: (i, 0)),
        ),
        compiler_params=pltpu.CompilerParams(
            dimension_semantics=("parallel",),   # shards the 2 C_out slabs across v7x cores
        ),
    )(g_col, x_mat, w_mat)

    # Straight view back to NCHW -- no transpose needed in this layout.
    return out_mat.reshape(N, C_out, H, W)


def reference(x211, x215, weight):
    """Pure-JAX f32 reference mirroring the PyTorch forward."""
    g = jax.nn.sigmoid(x215)                                   # (1, C_in, 1, 1)
    xm = x211 * g                                              # broadcast mul
    w = weight.reshape(weight.shape[0], weight.shape[1])       # (C_out, C_in)
    return jnp.einsum("nchw,oc->nohw", xm, w)


if __name__ == "__main__":
    key = jax.random.PRNGKey(0)
    k1, k2, k3 = jax.random.split(key, 3)

    N, C_in, H, W = 1, 1152, 7, 7
    C_out = 192

    x211 = jax.random.normal(k1, (N, C_in, H, W), dtype=jnp.float32)
    x215 = jax.random.normal(k2, (N, C_in, 1, 1), dtype=jnp.float32)
    # Deterministic synthetic conv weight (kaiming-ish scale), PyTorch layout.
    weight = jax.random.normal(k3, (C_out, C_in, 1, 1), dtype=jnp.float32) * (1.0 / (C_in ** 0.5))

    out = sigmoid_mul_conv1x1(x211, x215, weight)
    out = jax.block_until_ready(out)

    ref = reference(x211, x215, weight)
    assert out.shape == (N, C_out, H, W), out.shape
    # bf16 MXU operands with f32 accumulation over K=1152 -> compare with a
    # bf16-appropriate tolerance against the f32 reference.
    err = float(jnp.max(jnp.abs(out - ref)))
    assert jnp.allclose(out, ref, atol=2e-2, rtol=2e-2), err

    print("KERNEL_OK")
</pallas_src>

<mosaic_0001>
module attributes {stable_mosaic.version = 11 : i64} {
  func.func @_gated_conv1x1_kernel(%arg0: i32, %arg1: memref<1152x1xf32, #tpu.memory_space<vmem>>, %arg2: memref<1152x49xf32, #tpu.memory_space<vmem>>, %arg3: memref<96x1152xf32, #tpu.memory_space<vmem>>, %arg4: memref<96x49xf32, #tpu.memory_space<vmem>>) attributes {dimension_semantics = [#tpu.dimension_semantics<parallel>], iteration_bounds = array<i64: 2>, scalar_prefetch = 0 : i64, scratch_operands = 0 : i64, tpu.core_type = #tpu.core_type<tc>, window_params = [{pipeline_mode = #tpu.pipeline_mode<synchronous>, transform_indices = @transform_0, window_bounds = array<i64: 1152, 1>}, {pipeline_mode = #tpu.pipeline_mode<synchronous>, transform_indices = @transform_1, window_bounds = array<i64: 1152, 49>}, {transform_indices = @transform_2, window_bounds = array<i64: 96, 1152>}, {transform_indices = @transform_3, window_bounds = array<i64: 96, 49>}]} {
    %c0 = arith.constant 0 : index
    %c0_0 = arith.constant 0 : index
    %0 = vector.load %arg1[%c0, %c0_0] : memref<1152x1xf32, #tpu.memory_space<vmem>>, vector<1152x1xf32>
    %1 = arith.negf %0 : vector<1152x1xf32>
    %2 = math.exp %1 : vector<1152x1xf32>
    %cst = arith.constant 1.000000e+00 : f32
    %3 = vector.broadcast %cst : f32 to vector<1152x1xf32>
    %4 = arith.addf %3, %2 : vector<1152x1xf32>
    %5 = arith.divf %3, %4 : vector<1152x1xf32>
    %c0_1 = arith.constant 0 : index
    %c0_2 = arith.constant 0 : index
    %6 = vector.load %arg2[%c0_1, %c0_2] : memref<1152x49xf32, #tpu.memory_space<vmem>>, vector<1152x49xf32>
    %7 = vector.broadcast %5 : vector<1152x1xf32> to vector<1152x49xf32>
    %8 = arith.mulf %6, %7 : vector<1152x49xf32>
    %9 = arith.truncf %8 : vector<1152x49xf32> to vector<1152x49xbf16>
    %c0_3 = arith.constant 0 : index
    %c0_4 = arith.constant 0 : index
    %10 = vector.load %arg3[%c0_3, %c0_4] : memref<96x1152xf32, #tpu.memory_space<vmem>>, vector<96x1152xf32>
    %11 = arith.truncf %10 : vector<96x1152xf32> to vector<96x1152xbf16>
    %cst_5 = arith.constant dense<0.000000e+00> : vector<96x49xf32>
    %12 = tpu.matmul %11, %9, %cst_5 {dimension_numbers = #tpu.dot_dimension_numbers<[1], [0], [0], [1], [0, 0, 1, 1], [], []>} : vector<96x1152xbf16>, vector<1152x49xbf16>, vector<96x49xf32> -> vector<96x49xf32>
    %c0_6 = arith.constant 0 : index
    %c0_7 = arith.constant 0 : index
    %13 = vector.load %arg4[%c0_6, %c0_7] : memref<96x49xf32, #tpu.memory_space<vmem>>, vector<96x49xf32>
    tpu.vector_store %arg4[%c0_6, %c0_7], %12 {strides = array<i32>} : memref<96x49xf32, #tpu.memory_space<vmem>>, vector<96x49xf32>,
    return
  }
  func.func @transform_0(%arg0: i32) -> (i32, i32) {
    %c0_i32 = arith.constant 0 : i32
    %c0_i32_0 = arith.constant 0 : i32
    %c0_i32_1 = arith.constant 0 : i32
    return %c0_i32, %c0_i32_0 : i32, i32
  }
  func.func @transform_1(%arg0: i32) -> (i32, i32) {
    %c0_i32 = arith.constant 0 : i32
    %c0_i32_0 = arith.constant 0 : i32
    %c0_i32_1 = arith.constant 0 : i32
    return %c0_i32, %c0_i32_0 : i32, i32
  }
  func.func @transform_2(%arg0: i32) -> (i32, i32) {
    %c0_i32 = arith.constant 0 : i32
    %c0_i32_0 = arith.constant 0 : i32
    return %arg0, %c0_i32 : i32, i32
  }
  func.func @transform_3(%arg0: i32) -> (i32, i32) {
    %c0_i32 = arith.constant 0 : i32
    %c0_i32_0 = arith.constant 0 : i32
    return %arg0, %c0_i32 : i32, i32
  }
}

</mosaic_0001>

<bundles_post_ra>
// kernel: tpu_custom_call.1
= control target key start
LH: loop header
LB: loop body
LE: loop exit
PB: predicated region body
PF: predicated region fallthrough
CT: control target
= control target key end

     0   :  { %s3938_s12 = smov 0   ;;  %s5285_s0 = inlined_call_operand.vmem [shape: f32[1152,1], index: 0, kind: input, shape index: {}]   ;;  %s5286_s1 = inlined_call_operand.vmem [shape: f32[1152,49], index: 1, kind: input, shape index: {}]   ;;  %s5287_s2 = inlined_call_operand.vmem [shape: f32[192,1152], index: 2, kind: input, shape index: {}]   ;;  %s5288_s3 = inlined_call_operand.vmem [shape: f32[192,49], index: 3, kind: output, shape index: {}]  }
   0x1 LB: > { %s2902_s13 = sadd.s32 4294967295, %s3915_s12   ;;  %p2906_p0 = scmp.ge.s32.totalorder %s3915_s12, 1  ;;  %s3915_s12 = sphi %s3938_s12, %s13_s12  }
   0x2   : > { %p139_p1 = scmp.lt.s32.totalorder %s3915_s12, 3 }
   0x4   : > { %p140_p2 = pnand %p2906_p0, %p139_p1 }
   0x6   : > { %143 = sbr.rel (%p140_p2) target bundleno = 678 (0x2a6), region = 32 }
   0xb   : > { %v180_v0 = vld [vmem:[%s5285_s0 + $0x10] sm:$0xff]  ;;  %v178_v1 = vld [vmem:[%s5285_s0] sm:$0xff]  ;;  %v181_v2 = vld [vmem:[%s5285_s0 + $0x18] sm:$0xff]  ;;  %v3917_v3 = vmov 0   ;;  %s164_s24 = smul.u32 12, %s2902_s13  ;;  %vm2833_vm0 = vcmask 400384  }
   0xc   : > { %3332 = vset.pattern.permute.xlu1 %v3917_v3  ;;  %3331 = vset.pattern.permute.xlu0 %v3917_v3  ;;  %v2911_v4 = vmul.f32 -1.442695, %v180_v0  ;;  %v2909_v5 = vmul.f32 -1.442695, %v178_v1  ;;  %v2912_v6 = vmul.f32 -1.442695, %v181_v2 }
   0xd   : > { %v179_v7 = vld [vmem:[%s5285_s0 + $0x8] sm:$0xff]  ;;  %v182_v9 = vld [vmem:[%s5285_s0 + $0x20] sm:$0xff]  ;;  %v185_v13 = vld [vmem:[%s5285_s0 + $0x38] sm:$0xff]  ;;  %p165_p3 = scmp.lt.s32.totalorder %s164_s24, 23 }
   0xe   : > { %v183_v8 = vld [vmem:[%s5285_s0 + $0x28] sm:$0xff]  ;;  %3333 = vpow2.f32 %v2911_v4  ;;  %v2910_v10 = vmul.f32 -1.442695, %v179_v7  ;;  %v2913_v12 = vmul.f32 -1.442695, %v182_v9  ;;  %v184_v14 = vld [vmem:[%s5285_s0 + $0x30] sm:$0xff] }
   0xf   : > { %v2914_v11 = vmul.f32 -1.442695, %v183_v8  ;;  %3335 = vpow2.f32 %v2909_v5  ;;  %v187_v15 = vld [vmem:[%s5285_s0 + $0x48] sm:$0xff]  ;;  %v2916_v16 = vmul.f32 -1.442695, %v185_v13  ;;  %v186_v18 = vld [vmem:[%s5285_s0 + $0x40] sm:$0xff] }
  0x10   : > { %3337 = vpow2.f32 %v2912_v6  ;;  %v2915_v17 = vmul.f32 -1.442695, %v184_v14  ;;  %v189_v19 = vld [vmem:[%s5285_s0 + $0x58] sm:$0xff]  ;;  %v2918_v20 = vmul.f32 -1.442695, %v187_v15  ;;  %v188_v21 = vld [vmem:[%s5285_s0 + $0x50] sm:$0xff] }
  0x11   : > { %3339 = vpow2.f32 %v2910_v10  ;;  %v2917_v22 = vmul.f32 -1.442695, %v186_v18  ;;  %v191_v23 = vld [vmem:[%s5285_s0 + $0x68] sm:$0xff]  ;;  %v2920_v24 = vmul.f32 -1.442695, %v189_v19  ;;  %v190_v25 = vld [vmem:[%s5285_s0 + $0x60] sm:$0xff] }
  0x12   : > { %3341 = vpow2.f32 %v2914_v11  ;;  %v2919_v26 = vmul.f32 -1.442695, %v188_v21  ;;  %v193_v27 = vld [vmem:[%s5285_s0 + $0x78] sm:$0xff]  ;;  %v2922_v28 = vmul.f32 -1.442695, %v191_v23  ;;  %v192_v29 = vld [vmem:[%s5285_s0 + $0x70] sm:$0xff] }
  0x13   : > { %3343 = vpow2.f32 %v2913_v12  ;;  %v2921_v30 = vmul.f32 -1.442695, %v190_v25  ;;  %v2924_v31 = vmul.f32 -1.442695, %v193_v27  ;;  %v2923_v32 = vmul.f32 -1.442695, %v192_v29 }
  0x14   : > { %3345 = vpow2.f32 %v2916_v16  ;;  %v195_v58 = vld [vmem:[%s5285_s0 + $0x88] sm:$0xff]  ;;  %v194_v61 = vld [vmem:[%s5285_s0 + $0x80] sm:$0xff]  ;;  %v197_v0 = vld [vmem:[%s5285_s0 + $0x98] sm:$0xff]  ;;  %s5320_s24 = smov (!%p165_p3, %s164_s24), 23 }
  0x15   : > { %3347 = vpow2.f32 %v2915_v17  ;;  %v2926_v3 = vmul.f32 -1.442695, %v195_v58  ;;  %v196_v4 = vld [vmem:[%s5285_s0 + $0x90] sm:$0xff]  ;;  %v2925_v7 = vmul.f32 -1.442695, %v194_v61  ;;  %v199_v8 = vld [vmem:[%s5285_s0 + $0xa8] sm:$0xff] }
  0x16   : > { %3349 = vpow2.f32 %v2918_v20  ;;  %v2928_v10 = vmul.f32 -1.442695, %v197_v0  ;;  %v198_v11 = vld [vmem:[%s5285_s0 + $0xa0] sm:$0xff]  ;;  %v2927_v13 = vmul.f32 -1.442695, %v196_v4  ;;  %v201_v14 = vld [vmem:[%s5285_s0 + $0xb8] sm:$0xff] }
  0x17   : > { %3351 = vpow2.f32 %v2917_v22  ;;  %v2930_v16 = vmul.f32 -1.442695, %v199_v8  ;;  %v200_v17 = vld [vmem:[%s5285_s0 + $0xb0] sm:$0xff]  ;;  %v2929_v19 = vmul.f32 -1.442695, %v198_v11  ;;  %v203_v20 = vld [vmem:[%s5285_s0 + $0xc8] sm:$0xff] }
  0x18   : > { %3353 = vpow2.f32 %v2920_v24  ;;  %v2932_v22 = vmul.f32 -1.442695, %v201_v14  ;;  %v202_v23 = vld [vmem:[%s5285_s0 + $0xc0] sm:$0xff]  ;;  %v2931_v25 = vmul.f32 -1.442695, %v200_v17  ;;  %v204_v29 = vld [vmem:[%s5285_s0 + $0xd0] sm:$0xff] }
  0x19   : > { %3355 = vpow2.f32 %v2919_v26  ;;  %v205_v26 = vld [vmem:[%s5285_s0 + $0xd8] sm:$0xff]  ;;  %s3321_s5 = smul.u32 72, %s5320_s24 }
  0x1a   : > { %3357 = vpow2.f32 %v2922_v28  ;;  %v2934_v28 = vmul.f32 -1.442695, %v203_v20  ;;  %v212_v20 = vld [vmem:[%s5285_s0 + $0x110] sm:$0xff] }
  0x1b   : > { %v3334_v33 = vpop.eup %3333  ;;  %3359 = vpow2.f32 %v2921_v30  ;;  %s4220_s14 = scalar_lea.vmem %s5287_s2, %s3321_s5 }
  0x1c   : > { %v3336_v34 = vpop.eup %3335  ;;  %v756_v35 = vadd.f32 1.0, %v3334_v33  ;;  %3361 = vpow2.f32 %v2924_v31  ;;  %v2933_v31 = vmul.f32 -1.442695, %v202_v23 }
  0x1d   : > { %v3338_v36 = vpop.eup %3337  ;;  %v754_v37 = vadd.f32 1.0, %v3336_v34  ;;  %3363 = vpow2.f32 %v2923_v32  ;;  %v207_v32 = vld [vmem:[%s5285_s0 + $0xe8] sm:$0xff]  ;;  %v2936_v34 = vmul.f32 -1.442695, %v205_v26 }
  0x1e   : > { %v3340_v38 = vpop.eup %3339  ;;  %3365 = vrcp.f32 %v756_v35  ;;  %v757_v39 = vadd.f32 1.0, %v3338_v36  ;;  %v206_v35 = vld [vmem:[%s5285_s0 + $0xe0] sm:$0xff] }
  0x1f   : > { %v3342_v40 = vpop.eup %3341  ;;  %3367 = vrcp.f32 %v754_v37  ;;  %v755_v41 = vadd.f32 1.0, %v3340_v38  ;;  %v2935_v37 = vmul.f32 -1.442695, %v204_v29  ;;  %v209_v38 = vld [vmem:[%s5285_s0 + $0xf8] sm:$0xff]  ;;  %v2943_v29 = vmul.f32 -1.442695, %v212_v20 }
  0x20   : > { %v3344_v42 = vpop.eup %3343  ;;  %3369 = vrcp.f32 %v757_v39  ;;  %v759_v43 = vadd.f32 1.0, %v3342_v40  ;;  %v2938_v40 = vmul.f32 -1.442695, %v207_v32 }
  0x21   : > { %v3346_v44 = vpop.eup %3345  ;;  %3371 = vrcp.f32 %v755_v41  ;;  %v758_v45 = vadd.f32 1.0, %v3344_v42  ;;  %v208_v41 = vld [vmem:[%s5285_s0 + $0xf0] sm:$0xff] }
  0x22   : > { %v3348_v46 = vpop.eup %3347  ;;  %3373 = vrcp.f32 %v759_v43  ;;  %v761_v47 = vadd.f32 1.0, %v3346_v44  ;;  %v2937_v43 = vmul.f32 -1.442695, %v206_v35 }
  0x23   : > { %v3350_v48 = vpop.eup %3349  ;;  %3375 = vrcp.f32 %v758_v45  ;;  %v760_v49 = vadd.f32 1.0, %v3348_v46  ;;  %v2940_v45 = vmul.f32 -1.442695, %v209_v38 }
  0x24   : > { %v3352_v50 = vpop.eup %3351  ;;  %3377 = vrcp.f32 %v761_v47  ;;  %v763_v51 = vadd.f32 1.0, %v3350_v48  ;;  %v2939_v47 = vmul.f32 -1.442695, %v208_v41 }
  0x25   : > { %v3354_v52 = vpop.eup %3353  ;;  %3379 = vrcp.f32 %v760_v49  ;;  %v762_v53 = vadd.f32 1.0, %v3352_v50 }
  0x26   : > { %v3356_v54 = vpop.eup %3355  ;;  %3381 = vrcp.f32 %v763_v51  ;;  %v765_v55 = vadd.f32 1.0, %v3354_v52 }
  0x27   : > { %v3358_v56 = vpop.eup %3357  ;;  %3383 = vrcp.f32 %v762_v53  ;;  %v764_v57 = vadd.f32 1.0, %v3356_v54 }
  0x28   : > { %v3360_v59 = vpop.eup %3359  ;;  %3385 = vrcp.f32 %v765_v55  ;;  %v767_v60 = vadd.f32 1.0, %v3358_v56 }
  0x29   : > { %v3362_v62 = vpop.eup %3361  ;;  %3387 = vrcp.f32 %v764_v57  ;;  %v766_v63 = vadd.f32 1.0, %v3360_v59 }
  0x2a   : > { %v3364_v1 = vpop.eup %3363  ;;  %3389 = vrcp.f32 %v767_v60  ;;  %v769_v2 = vadd.f32 1.0, %v3362_v62 }
  0x2b   : > { %v3366_v5 = vpop.eup %3365  ;;  %3391 = vrcp.f32 %v766_v63  ;;  %v768_v6 = vadd.f32 1.0, %v3364_v1 }
  0x2c   : > { %v3368_v9 = vpop.eup %3367  ;;  %1342 = vperm.xlu1 %3332, %v3366_v5   ;;  %3393 = vrcp.f32 %v769_v2 }
  0x2d   : > { %v3370_v12 = vpop.eup %3369  ;;  %1332 = vperm.xlu0 %3331, %v3368_v9   ;;  %3395 = vrcp.f32 %v768_v6 }
  0x2e   : > { %v3372_v15 = vpop.eup %3371  ;;  %3397 = vpow2.f32 %v2926_v3 }
  0x2f   : > { %v3374_v18 = vpop.eup %3373  ;;  %3399 = vpow2.f32 %v2925_v7 }
  0x30   : > { %v3376_v21 = vpop.eup %3375  ;;  %1347 = vperm.xlu1 %3332, %v3370_v12   ;;  %3401 = vpow2.f32 %v2928_v10  ;;  %v211_v10 = vld [vmem:[%s5285_s0 + $0x108] sm:$0xff] }
  0x31   : > { %v3378_v24 = vpop.eup %3377  ;;  %1337 = vperm.xlu0 %3331, %v3372_v15   ;;  %3403 = vpow2.f32 %v2927_v13  ;;  %v210_v13 = vld [vmem:[%s5285_s0 + $0x100] sm:$0xff] }
  0x32   : > { %v3380_v27 = vpop.eup %3379  ;;  %3405 = vpow2.f32 %v2930_v16  ;;  %v213_v16 = vld [vmem:[%s5285_s0 + $0x118] sm:$0xff]  ;;  %v2941_v23 = vmul.f32 -1.442695, %v210_v13 }
  0x33   : > { %v3382_v30 = vpop.eup %3381  ;;  %3407 = vpow2.f32 %v2929_v19  ;;  %v2942_v19 = vmul.f32 -1.442695, %v211_v10  ;;  %v2944_v26 = vmul.f32 -1.442695, %v213_v16 }
  0x34   : > { %v3384_v33 = vpop.eup %3383  ;;  %1357 = vperm.xlu1 %3332, %v3374_v18   ;;  %3409 = vpow2.f32 %v2932_v22 }
  0x35   : > { %v3386_v36 = vpop.eup %3385  ;;  %1352 = vperm.xlu0 %3331, %v3376_v21   ;;  %3411 = vpow2.f32 %v2931_v25 }
  0x36   : > { %v3388_v39 = vpop.eup %3387  ;;  %3413 = vpow2.f32 %v2934_v28 }
  0x37   : > { %v3390_v42 = vpop.eup %3389  ;;  %3415 = vpow2.f32 %v2933_v31 }
  0x38   : > { %v3392_v44 = vpop.eup %3391  ;;  %1367 = vperm.xlu1 %3332, %v3378_v24   ;;  %3417 = vpow2.f32 %v2936_v34  ;;  %v215_v24 = vld [vmem:[%s5285_s0 + $0x128] sm:$0xff] }
  0x39   : > { %v3394_v46 = vpop.eup %3393  ;;  %1362 = vperm.xlu0 %3331, %v3380_v27   ;;  %3419 = vpow2.f32 %v2935_v37  ;;  %v214_v27 = vld [vmem:[%s5285_s0 + $0x120] sm:$0xff]  ;;  %v2946_v32 = vmul.f32 -1.442695, %v215_v24 }
  0x3a   : > { %v3396_v48 = vpop.eup %3395  ;;  %3421 = vpow2.f32 %v2938_v40  ;;  %v2945_v35 = vmul.f32 -1.442695, %v214_v27 }
  0x3b   : > { %v3398_v49 = vpop.eup %3397  ;;  %3423 = vpow2.f32 %v2937_v43 }
  0x3c   : > { %v3400_v50 = vpop.eup %3399  ;;  %1377 = vperm.xlu1 %3332, %v3382_v30   ;;  %v771_v51 = vadd.f32 1.0, %v3398_v49  ;;  %3425 = vpow2.f32 %v2940_v45  ;;  %v217_v30 = vld [vmem:[%s5285_s0 + $0x138] sm:$0xff]  ;;  %v220_v45 = vld [vmem:[%s5285_s0 + $0x150] sm:$0xff] }
  0x3d   : > { %v3402_v52 = vpop.eup %3401  ;;  %1372 = vperm.xlu0 %3331, %v3384_v33   ;;  %v770_v53 = vadd.f32 1.0, %v3400_v50  ;;  %3427 = vpow2.f32 %v2939_v47  ;;  %v216_v33 = vld [vmem:[%s5285_s0 + $0x130] sm:$0xff]  ;;  %v2948_v38 = vmul.f32 -1.442695, %v217_v30 }
  0x3e   : > { %v3404_v54 = vpop.eup %3403  ;;  %3429 = vrcp.f32 %v771_v51  ;;  %v773_v55 = vadd.f32 1.0, %v3402_v52  ;;  %v2947_v41 = vmul.f32 -1.442695, %v216_v33  ;;  %v241_v51 = vld [vmem:[%s5285_s0 + $0x1f8] sm:$0xff] }
  0x3f   : > { %v3406_v56 = vpop.eup %3405  ;;  %3431 = vrcp.f32 %v770_v53  ;;  %v772_v57 = vadd.f32 1.0, %v3404_v54  ;;  %v2951_v53 = vmul.f32 -1.442695, %v220_v45  ;;  %v238_v54 = vld [vmem:[%s5285_s0 + $0x1e0] sm:$0xff] }
  0x40   : > { %v3408_v58 = vpop.eup %3407  ;;  %1387 = vperm.xlu1 %3332, %v3386_v36   ;;  %3433 = vrcp.f32 %v773_v55  ;;  %v775_v59 = vadd.f32 1.0, %v3406_v56  ;;  %v219_v36 = vld [vmem:[%s5285_s0 + $0x148] sm:$0xff] }
  0x41   : > { %v3410_v60 = vpop.eup %3409  ;;  %1382 = vperm.xlu0 %3331, %v3388_v39   ;;  %3435 = vrcp.f32 %v772_v57  ;;  %v774_v61 = vadd.f32 1.0, %v3408_v58  ;;  %v218_v39 = vld [vmem:[%s5285_s0 + $0x140] sm:$0xff]  ;;  %v225_v57 = vld [vmem:[%s5285_s0 + $0x178] sm:$0xff] }
  0x42   : > { %v3412_v62 = vpop.eup %3411  ;;  %3437 = vrcp.f32 %v775_v59  ;;  %v777_v63 = vadd.f32 1.0, %v3410_v60  ;;  %v2949_v47 = vmul.f32 -1.442695, %v218_v39  ;;  %v2972_v59 = vmul.f32 -1.442695, %v241_v51 }
  0x43   : > { %v3414_v0 = vpop.eup %3413  ;;  %3439 = vrcp.f32 %v774_v61  ;;  %v776_v1 = vadd.f32 1.0, %v3412_v62  ;;  %v2969_v61 = vmul.f32 -1.442695, %v238_v54 }
  0x44   : > { %v3416_v2 = vpop.eup %3415  ;;  %1397 = vperm.xlu1 %3332, %v3390_v42   ;;  %3441 = vrcp.f32 %v777_v63  ;;  %v779_v3 = vadd.f32 1.0, %v3414_v0  ;;  %v240_v42 = vld [vmem:[%s5285_s0 + $0x1f0] sm:$0xff]  ;;  %v2956_v63 = vmul.f32 -1.442695, %v225_v57 }
  0x45   : > { %v3418_v4 = vpop.eup %3417  ;;  %1392 = vperm.xlu0 %3331, %v3392_v44   ;;  %3443 = vrcp.f32 %v776_v1  ;;  %v778_v5 = vadd.f32 1.0, %v3416_v2  ;;  %v2950_v44 = vmul.f32 -1.442695, %v219_v36  ;;  %v2971_v50 = vmul.f32 -1.442695, %v240_v42  ;;  %v223_v36 = vld [vmem:[%s5285_s0 + $0x168] sm:$0xff] }
  0x46   : > { %v3420_v6 = vpop.eup %3419  ;;  %3445 = vrcp.f32 %v779_v3  ;;  %v781_v7 = vadd.f32 1.0, %v3418_v4  ;;  %v2954_v45 = vmul.f32 -1.442695, %v223_v36 }
  0x47   : > { %v3422_v8 = vpop.eup %3421  ;;  %3447 = vrcp.f32 %v778_v5  ;;  %v780_v9 = vadd.f32 1.0, %v3420_v6 }
  0x48   : > { %v3424_v11 = vpop.eup %3423  ;;  %1407 = vperm.xlu1 %3332, %v3394_v46   ;;  %3449 = vrcp.f32 %v781_v7  ;;  %v783_v12 = vadd.f32 1.0, %v3422_v8 }
  0x49   : > { %v3426_v14 = vpop.eup %3425  ;;  %1402 = vperm.xlu0 %3331, %v3396_v48   ;;  %3451 = vrcp.f32 %v780_v9  ;;  %v782_v15 = vadd.f32 1.0, %v3424_v11  ;;  %v224_v48 = vld [vmem:[%s5285_s0 + $0x170] sm:$0xff] }
  0x4a   : > { %v3428_v17 = vpop.eup %3427  ;;  %3453 = vrcp.f32 %v783_v12  ;;  %v785_v18 = vadd.f32 1.0, %v3426_v14  ;;  %v2955_v56 = vmul.f32 -1.442695, %v224_v48 }
  0x4b   : > { %v3430_v21 = vpop.eup %3429  ;;  %3455 = vrcp.f32 %v782_v15  ;;  %v784_v22 = vadd.f32 1.0, %v3428_v17 }
  0x4c   : > { %v3432_v25 = vpop.eup %3431  ;;  %1417 = vperm.xlu1 %3332, %v3430_v21   ;;  %3457 = vrcp.f32 %v785_v18 }
  0x4d   : > { %v3434_v28 = vpop.eup %3433  ;;  %1412 = vperm.xlu0 %3331, %v3432_v25   ;;  %3459 = vrcp.f32 %v784_v22 }
  0x4e   : > { %v3436_v31 = vpop.eup %3435  ;;  %3461 = vpow2.f32 %v2942_v19 }
  0x4f   : > { %v3438_v34 = vpop.eup %3437  ;;  %3463 = vpow2.f32 %v2941_v23 }
  0x50   : > { %v3440_v37 = vpop.eup %3439  ;;  %1427 = vperm.xlu1 %3332, %v3434_v28   ;;  %3465 = vpow2.f32 %v2944_v26  ;;  %v222_v26 = vld [vmem:[%s5285_s0 + $0x160] sm:$0xff] }
  0x51   : > { %v3442_v40 = vpop.eup %3441  ;;  %1422 = vperm.xlu0 %3331, %v3436_v31   ;;  %3467 = vpow2.f32 %v2943_v29  ;;  %v239_v29 = vld [vmem:[%s5285_s0 + $0x1e8] sm:$0xff] }
  0x52   : > { %v3444_v43 = vpop.eup %3443  ;;  %3469 = vpow2.f32 %v2946_v32  ;;  %v236_v32 = vld [vmem:[%s5285_s0 + $0x1d0] sm:$0xff]  ;;  %v2970_v39 = vmul.f32 -1.442695, %v239_v29 }
  0x53   : > { %v3446_v46 = vpop.eup %3445  ;;  %3471 = vpow2.f32 %v2945_v35  ;;  %v2953_v35 = vmul.f32 -1.442695, %v222_v26  ;;  %v2967_v42 = vmul.f32 -1.442695, %v236_v32 }
  0x54   : > { %v3448_v49 = vpop.eup %3447  ;;  %1437 = vperm.xlu1 %3332, %v3438_v34   ;;  %3473 = vpow2.f32 %v2948_v38 }
  0x55   : > { %v3450_v52 = vpop.eup %3449  ;;  %1432 = vperm.xlu0 %3331, %v3440_v37   ;;  %3475 = vpow2.f32 %v2947_v41 }
  0x56   : > { %v3452_v55 = vpop.eup %3451  ;;  %3477 = vpow2.f32 %v2950_v44 }
  0x57   : > { %v3454_v58 = vpop.eup %3453  ;;  %3479 = vpow2.f32 %v2949_v47 }
  0x58   : > { %v3456_v60 = vpop.eup %3455  ;;  %1447 = vperm.xlu1 %3332, %v3442_v40   ;;  %3481 = vpow2.f32 %v2971_v50  ;;  %v221_v40 = vld [vmem:[%s5285_s0 + $0x158] sm:$0xff] }
  0x59   : > { %v3458_v62 = vpop.eup %3457  ;;  %1442 = vperm.xlu0 %3331, %v3444_v43   ;;  %3483 = vpow2.f32 %v2951_v53  ;;  %v237_v43 = vld [vmem:[%s5285_s0 + $0x1d8] sm:$0xff]  ;;  %v2952_v48 = vmul.f32 -1.442695, %v221_v40 }
  0x5a   : > { %v3460_v0 = vpop.eup %3459  ;;  %3485 = vpow2.f32 %v2955_v56  ;;  %v2968_v51 = vmul.f32 -1.442695, %v237_v43 }
  0x5b   : > { %v3462_v1 = vpop.eup %3461  ;;  %3487 = vpow2.f32 %v2972_v59 }
  0x5c   : > { %v3464_v2 = vpop.eup %3463  ;;  %1457 = vperm.xlu1 %3332, %v3446_v46   ;;  %v787_v3 = vadd.f32 1.0, %v3462_v1  ;;  %3489 = vpow2.f32 %v2969_v61  ;;  %v235_v46 = vld [vmem:[%s5285_s0 + $0x1c8] sm:$0xff]  ;;  %v230_v61 = vld [vmem:[%s5285_s0 + $0x1a0] sm:$0xff] }
  0x5d   : > { %v3466_v4 = vpop.eup %3465  ;;  %1452 = vperm.xlu0 %3331, %v3448_v49   ;;  %v786_v5 = vadd.f32 1.0, %v3464_v2  ;;  %3491 = vpow2.f32 %v2956_v63  ;;  %v234_v49 = vld [vmem:[%s5285_s0 + $0x1c0] sm:$0xff]  ;;  %v2966_v54 = vmul.f32 -1.442695, %v235_v46 }
  0x5e   : > { %v3468_v6 = vpop.eup %3467  ;;  %3493 = vrcp.f32 %v787_v3  ;;  %v789_v7 = vadd.f32 1.0, %v3466_v4  ;;  %v2965_v57 = vmul.f32 -1.442695, %v234_v49  ;;  %v228_v3 = vld [vmem:[%s5285_s0 + $0x190] sm:$0xff] }
  0x5f   : > { %v3470_v8 = vpop.eup %3469  ;;  %3495 = vrcp.f32 %v786_v5  ;;  %v788_v9 = vadd.f32 1.0, %v3468_v6  ;;  %v2961_v5 = vmul.f32 -1.442695, %v230_v61  ;;  %v227_v6 = vld [vmem:[%s5285_s0 + $0x188] sm:$0xff] }
  0x60   : > { %v3472_v10 = vpop.eup %3471  ;;  %1467 = vperm.xlu1 %3332, %v3450_v52   ;;  %3497 = vrcp.f32 %v789_v7  ;;  %v791_v11 = vadd.f32 1.0, %v3470_v8  ;;  %v233_v52 = vld [vmem:[%s5285_s0 + $0x1b8] sm:$0xff] }
  0x61   : > { %v3474_v12 = vpop.eup %3473  ;;  %1462 = vperm.xlu0 %3331, %v3452_v55   ;;  %3499 = vrcp.f32 %v788_v9  ;;  %v790_v13 = vadd.f32 1.0, %v3472_v10  ;;  %v232_v55 = vld [vmem:[%s5285_s0 + $0x1b0] sm:$0xff]  ;;  %v226_v9 = vld [vmem:[%s5285_s0 + $0x180] sm:$0xff] }
  0x62   : > { %v3476_v14 = vpop.eup %3475  ;;  %3501 = vrcp.f32 %v791_v11  ;;  %v793_v15 = vadd.f32 1.0, %v3474_v12  ;;  %v2963_v63 = vmul.f32 -1.442695, %v232_v55  ;;  %v2959_v11 = vmul.f32 -1.442695, %v228_v3 }
  0x63   : > { %v3478_v16 = vpop.eup %3477  ;;  %3503 = vrcp.f32 %v790_v13  ;;  %v792_v17 = vadd.f32 1.0, %v3476_v14  ;;  %v2958_v13 = vmul.f32 -1.442695, %v227_v6 }
  0x64   : > { %v3480_v18 = vpop.eup %3479  ;;  %1477 = vperm.xlu1 %3332, %v3454_v58   ;;  %3505 = vrcp.f32 %v793_v15  ;;  %v795_v19 = vadd.f32 1.0, %v3478_v16  ;;  %v231_v58 = vld [vmem:[%s5285_s0 + $0x1a8] sm:$0xff]  ;;  %v2957_v15 = vmul.f32 -1.442695, %v226_v9 }
  0x65   : > { %v3482_v20 = vpop.eup %3481  ;;  %1472 = vperm.xlu0 %3331, %v3456_v60   ;;  %3507 = vrcp.f32 %v792_v17  ;;  %v794_v21 = vadd.f32 1.0, %v3480_v18  ;;  %v2964_v60 = vmul.f32 -1.442695, %v233_v52  ;;  %v2962_v2 = vmul.f32 -1.442695, %v231_v58  ;;  %v288_v52 = vld [vmem:[%s5285_s0 + $0x370] sm:$0xff] }
  0x66   : > { %v3484_v22 = vpop.eup %3483  ;;  %3509 = vrcp.f32 %v795_v19  ;;  %v816_v23 = vadd.f32 1.0, %v3482_v20  ;;  %v3019_v61 = vmul.f32 -1.442695, %v288_v52 }
  0x67   : > { %v3486_v24 = vpop.eup %3485  ;;  %3511 = vrcp.f32 %v794_v21  ;;  %v796_v25 = vadd.f32 1.0, %v3484_v22 }
  0x68   : > { %v3488_v27 = vpop.eup %3487  ;;  %1487 = vperm.xlu1 %3332, %v3458_v62   ;;  %3513 = vrcp.f32 %v816_v23  ;;  %v800_v28 = vadd.f32 1.0, %v3486_v24 }
  0x69   : > { %v3490_v30 = vpop.eup %3489  ;;  %1482 = vperm.xlu0 %3331, %v3460_v0   ;;  %3515 = vrcp.f32 %v796_v25  ;;  %v817_v31 = vadd.f32 1.0, %v3488_v27  ;;  %v229_v0 = vld [vmem:[%s5285_s0 + $0x198] sm:$0xff] }
  0x6a   : > { %v3492_v33 = vpop.eup %3491  ;;  %3517 = vrcp.f32 %v800_v28  ;;  %v814_v34 = vadd.f32 1.0, %v3490_v30  ;;  %v2960_v8 = vmul.f32 -1.442695, %v229_v0 }
  0x6b   : > { %v3494_v37 = vpop.eup %3493  ;;  %3519 = vrcp.f32 %v817_v31  ;;  %v801_v38 = vadd.f32 1.0, %v3492_v33 }
  0x6c   : > { %v3496_v41 = vpop.eup %3495  ;;  %1497 = vperm.xlu1 %3332, %v3494_v37   ;;  %3521 = vrcp.f32 %v814_v34 }
  0x6d   : > { %v3498_v44 = vpop.eup %3497  ;;  %1492 = vperm.xlu0 %3331, %v3496_v41   ;;  %3523 = vrcp.f32 %v801_v38 }
  0x6e   : > { %v3500_v47 = vpop.eup %3499  ;;  %3525 = vpow2.f32 %v2953_v35 }
  0x6f   : > { %v3502_v50 = vpop.eup %3501  ;;  %3527 = vpow2.f32 %v2970_v39 }
  0x70   : > { %v3504_v53 = vpop.eup %3503  ;;  %1507 = vperm.xlu1 %3332, %v3498_v44   ;;  %3529 = vpow2.f32 %v2967_v42  ;;  %v305_v42 = vld [vmem:[%s5285_s0 + $0x3f8] sm:$0xff] }
  0x71   : > { %v3506_v56 = vpop.eup %3505  ;;  %1502 = vperm.xlu0 %3331, %v3500_v47   ;;  %3531 = vpow2.f32 %v2954_v45  ;;  %v304_v45 = vld [vmem:[%s5285_s0 + $0x3f0] sm:$0xff] }
  0x72   : > { %v3508_v59 = vpop.eup %3507  ;;  %3533 = vpow2.f32 %v2952_v48  ;;  %v289_v48 = vld [vmem:[%s5285_s0 + $0x378] sm:$0xff]  ;;  %v3035_v55 = vmul.f32 -1.442695, %v304_v45 }
  0x73   : > { %v3510_v62 = vpop.eup %3509  ;;  %3535 = vpow2.f32 %v2968_v51  ;;  %v3036_v51 = vmul.f32 -1.442695, %v305_v42  ;;  %v3020_v58 = vmul.f32 -1.442695, %v289_v48 }
  0x74   : > { %v3512_v1 = vpop.eup %3511  ;;  %1517 = vperm.xlu1 %3332, %v3502_v50   ;;  %3537 = vpow2.f32 %v2966_v54 }
  0x75   : > { %v3514_v4 = vpop.eup %3513  ;;  %1512 = vperm.xlu0 %3331, %v3504_v53   ;;  %3539 = vpow2.f32 %v2965_v57 }
  0x76   : > { %v3516_v7 = vpop.eup %3515  ;;  %3541 = vpow2.f32 %v2964_v60 }
  0x77   : > { %v3518_v10 = vpop.eup %3517  ;;  %3543 = vpow2.f32 %v2963_v63 }
  0x78   : > { %v3520_v12 = vpop.eup %3519  ;;  %1527 = vperm.xlu1 %3332, %v3506_v56   ;;  %3545 = vpow2.f32 %v2962_v2  ;;  %v303_v56 = vld [vmem:[%s5285_s0 + $0x3e8] sm:$0xff] }
  0x79   : > { %v3522_v14 = vpop.eup %3521  ;;  %1522 = vperm.xlu0 %3331, %v3508_v59   ;;  %3547 = vpow2.f32 %v2961_v5  ;;  %v302_v59 = vld [vmem:[%s5285_s0 + $0x3e0] sm:$0xff]  ;;  %v3034_v0 = vmul.f32 -1.442695, %v303_v56 }
  0x7a   : > { %v3524_v16 = vpop.eup %3523  ;;  %3549 = vpow2.f32 %v2960_v8  ;;  %v3033_v3 = vmul.f32 -1.442695, %v302_v59  ;;  %v271_v59 = vld [vmem:[%s5285_s0 + $0x2e8] sm:$0xff] }
  0x7b   : > { %v3526_v17 = vpop.eup %3525  ;;  %3551 = vpow2.f32 %v2959_v11 }
  0x7c   : > { %v3528_v18 = vpop.eup %3527  ;;  %1537 = vperm.xlu1 %3332, %v3510_v62   ;;  %v798_v19 = vadd.f32 1.0, %v3526_v17  ;;  %3553 = vpow2.f32 %v2958_v13  ;;  %v287_v62 = vld [vmem:[%s5285_s0 + $0x368] sm:$0xff]  ;;  %v300_v13 = vld [vmem:[%s5285_s0 + $0x3d0] sm:$0xff] }
  0x7d   : > { %v3530_v20 = vpop.eup %3529  ;;  %1532 = vperm.xlu0 %3331, %v3512_v1   ;;  %v815_v21 = vadd.f32 1.0, %v3528_v18  ;;  %3555 = vpow2.f32 %v2957_v15  ;;  %v286_v1 = vld [vmem:[%s5285_s0 + $0x360] sm:$0xff]  ;;  %v3018_v6 = vmul.f32 -1.442695, %v287_v62 }
  0x7e   : > { %v3532_v22 = vpop.eup %3531  ;;  %3557 = vrcp.f32 %v798_v19  ;;  %v812_v23 = vadd.f32 1.0, %v3530_v20  ;;  %v3017_v9 = vmul.f32 -1.442695, %v286_v1  ;;  %v256_v19 = vld [vmem:[%s5285_s0 + $0x270] sm:$0xff] }
  0x7f   : > { %v3534_v24 = vpop.eup %3533  ;;  %3559 = vrcp.f32 %v815_v21  ;;  %v799_v25 = vadd.f32 1.0, %v3532_v22  ;;  %v3031_v21 = vmul.f32 -1.442695, %v300_v13  ;;  %v285_v22 = vld [vmem:[%s5285_s0 + $0x358] sm:$0xff] }
  0x80   : > { %v3536_v26 = vpop.eup %3535  ;;  %1642 = vperm.xlu1 %3332, %v3514_v4   ;;  %3561 = vrcp.f32 %v812_v23  ;;  %v797_v27 = vadd.f32 1.0, %v3534_v24  ;;  %v273_v4 = vld [vmem:[%s5285_s0 + $0x2f8] sm:$0xff] }
  0x81   : > { %v3538_v28 = vpop.eup %3537  ;;  %1542 = vperm.xlu0 %3331, %v3516_v7   ;;  %3563 = vrcp.f32 %v799_v25  ;;  %v813_v29 = vadd.f32 1.0, %v3536_v26  ;;  %v272_v7 = vld [vmem:[%s5285_s0 + $0x2f0] sm:$0xff] }
  0x82   : > { %v3540_v30 = vpop.eup %3539  ;;  %3565 = vrcp.f32 %v797_v27  ;;  %v811_v31 = vadd.f32 1.0, %v3538_v28  ;;  %v3003_v15 = vmul.f32 -1.442695, %v272_v7  ;;  %v284_v25 = vld [vmem:[%s5285_s0 + $0x350] sm:$0xff]  ;;  %v2987_v27 = vmul.f32 -1.442695, %v256_v19 }
  0x83   : > { %v3542_v32 = vpop.eup %3541  ;;  %3567 = vrcp.f32 %v813_v29  ;;  %v810_v33 = vadd.f32 1.0, %v3540_v30  ;;  %v3016_v29 = vmul.f32 -1.442695, %v285_v22  ;;  %v2269_v19 = vld [vmem:[%s4220_s14 + $0x18] sm:$0xff] }
  0x84   : > { %v3544_v34 = vpop.eup %3543  ;;  %1562 = vperm.xlu1 %3332, %v3518_v10   ;;  %3569 = vrcp.f32 %v811_v31  ;;  %v809_v35 = vadd.f32 1.0, %v3542_v32  ;;  %v301_v10 = vld [vmem:[%s5285_s0 + $0x3d8] sm:$0xff]  ;;  %v3015_v31 = vmul.f32 -1.442695, %v284_v25 }
  0x85   : > { %v3546_v36 = vpop.eup %3545  ;;  %1647 = vperm.xlu0 %3331, %v3520_v12   ;;  %3571 = vrcp.f32 %v810_v33  ;;  %v808_v37 = vadd.f32 1.0, %v3544_v34  ;;  %v3004_v12 = vmul.f32 -1.442695, %v273_v4  ;;  %v3032_v18 = vmul.f32 -1.442695, %v301_v10 }
  0x86   : > { %v3548_v38 = vpop.eup %3547  ;;  %3573 = vrcp.f32 %v809_v35  ;;  %v807_v39 = vadd.f32 1.0, %v3546_v36 }
  0x87   : > { %v3550_v40 = vpop.eup %3549  ;;  %3575 = vrcp.f32 %v808_v37  ;;  %v806_v41 = vadd.f32 1.0, %v3548_v38 }
  0x88   : > { %v3552_v43 = vpop.eup %3551  ;;  %1632 = vperm.xlu1 %3332, %v3522_v14   ;;  %3577 = vrcp.f32 %v807_v39  ;;  %v805_v44 = vadd.f32 1.0, %v3550_v40 }
  0x89   : > { %v3554_v46 = vpop.eup %3553  ;;  %1567 = vperm.xlu0 %3331, %v3524_v16   ;;  %3579 = vrcp.f32 %v806_v41  ;;  %v804_v47 = vadd.f32 1.0, %v3552_v43  ;;  %v257_v16 = vld [vmem:[%s5285_s0 + $0x278] sm:$0xff] }
  0x8a   : > { %v3556_v49 = vpop.eup %3555  ;;  %3581 = vrcp.f32 %v805_v44  ;;  %v803_v50 = vadd.f32 1.0, %v3554_v46  ;;  %v2988_v24 = vmul.f32 -1.442695, %v257_v16 }
  0x8b   : > { %v3558_v53 = vpop.eup %3557  ;;  %3583 = vrcp.f32 %v804_v47  ;;  %v802_v54 = vadd.f32 1.0, %v3556_v49 }
  0x8c   : > { %v3560_v57 = vpop.eup %3559  ;;  %1552 = vperm.xlu1 %3332, %v3558_v53   ;;  %3585 = vrcp.f32 %v803_v50 }
  0x8d   : > { %v3562_v60 = vpop.eup %3561  ;;  %1637 = vperm.xlu0 %3331, %v3560_v57   ;;  %3587 = vrcp.f32 %v802_v54 }
  0x8e   : > { %v3564_v63 = vpop.eup %3563  ;;  %3589 = vpow2.f32 %v3036_v51 }
  0x8f   : > { %v3566_v2 = vpop.eup %3565  ;;  %3591 = vpow2.f32 %v3035_v55 }
  0x90   : > { %v3568_v5 = vpop.eup %3567  ;;  %1622 = vperm.xlu1 %3332, %v3562_v60   ;;  %3593 = vpow2.f32 %v3020_v58 }
  0x91   : > { %v3570_v8 = vpop.eup %3569  ;;  %1557 = vperm.xlu0 %3331, %v3564_v63   ;;  %3595 = vpow2.f32 %v3019_v61  ;;  %v270_v63 = vld [vmem:[%s5285_s0 + $0x2e0] sm:$0xff] }
  0x92   : > { %v3572_v11 = vpop.eup %3571  ;;  %3597 = vpow2.f32 %v3034_v0  ;;  %v3001_v10 = vmul.f32 -1.442695, %v270_v63 }
  0x93   : > { %v3574_v14 = vpop.eup %3573  ;;  %3599 = vpow2.f32 %v3033_v3 }
  0x94   : > { %v3576_v17 = vpop.eup %3575  ;;  %1547 = vperm.xlu1 %3332, %v3566_v2   ;;  %3601 = vpow2.f32 %v3018_v6  ;;  %v299_v2 = vld [vmem:[%s5285_s0 + $0x3c8] sm:$0xff]  ;;  %v298_v6 = vld [vmem:[%s5285_s0 + $0x3c0] sm:$0xff] }
  0x95   : > { %v3578_v20 = vpop.eup %3577  ;;  %1627 = vperm.xlu0 %3331, %v3568_v5   ;;  %3603 = vpow2.f32 %v3017_v9  ;;  %v3002_v5 = vmul.f32 -1.442695, %v271_v59 }
  0x96   : > { %v3580_v23 = vpop.eup %3579  ;;  %3605 = vpow2.f32 %v3004_v12 }
  0x97   : > { %v3582_v26 = vpop.eup %3581  ;;  %3607 = vpow2.f32 %v3003_v15  ;;  %v254_v15 = vld [vmem:[%s5285_s0 + $0x260] sm:$0xff] }
  0x98   : > { %v3584_v28 = vpop.eup %3583  ;;  %1617 = vperm.xlu1 %3332, %v3570_v8   ;;  %3609 = vpow2.f32 %v3032_v18  ;;  %v283_v18 = vld [vmem:[%s5285_s0 + $0x348] sm:$0xff] }
  0x99   : > { %v3586_v30 = vpop.eup %3585  ;;  %1612 = vperm.xlu0 %3331, %v3572_v11   ;;  %3611 = vpow2.f32 %v3031_v21  ;;  %v255_v11 = vld [vmem:[%s5285_s0 + $0x268] sm:$0xff] }
  0x9a   : > { %v3588_v32 = vpop.eup %3587  ;;  %3613 = vpow2.f32 %v2988_v24  ;;  %v2986_v22 = vmul.f32 -1.442695, %v255_v11 }
  0x9b   : > { %v3590_v33 = vpop.eup %3589  ;;  %3615 = vpow2.f32 %v2987_v27  ;;  %v2985_v27 = vmul.f32 -1.442695, %v254_v15 }
  0x9c   : > { %v3592_v34 = vpop.eup %3591  ;;  %1607 = vperm.xlu1 %3332, %v3574_v14   ;;  %v881_v35 = vadd.f32 1.0, %v3590_v33  ;;  %3617 = vpow2.f32 %v3016_v29  ;;  %v3030_v14 = vmul.f32 -1.442695, %v299_v2 }
  0x9d   : > { %v3594_v36 = vpop.eup %3593  ;;  %1602 = vperm.xlu0 %3331, %v3576_v17   ;;  %v880_v37 = vadd.f32 1.0, %v3592_v34  ;;  %3619 = vpow2.f32 %v3015_v31  ;;  %v3029_v17 = vmul.f32 -1.442695, %v298_v6  ;;  %v3014_v31 = vmul.f32 -1.442695, %v283_v18 }
  0x9e   : > { %v3596_v38 = vpop.eup %3595  ;;  %3621 = vrcp.f32 %v881_v35  ;;  %v865_v39 = vadd.f32 1.0, %v3594_v36  ;;  %v297_v35 = vld [vmem:[%s5285_s0 + $0x3b8] sm:$0xff] }
  0x9f   : > { %v3598_v40 = vpop.eup %3597  ;;  %3623 = vrcp.f32 %v880_v37  ;;  %v864_v41 = vadd.f32 1.0, %v3596_v38  ;;  %v296_v38 = vld [vmem:[%s5285_s0 + $0x3b0] sm:$0xff] }
  0xa0   : > { %v3600_v42 = vpop.eup %3599  ;;  %1597 = vperm.xlu1 %3332, %v3578_v20   ;;  %3625 = vrcp.f32 %v865_v39  ;;  %v879_v43 = vadd.f32 1.0, %v3598_v40  ;;  %v2278_v20 = vld [vmem:[%s4220_s14 + $0x60] sm:$0xff] }
  0xa1   : > { %v3602_v44 = vpop.eup %3601  ;;  %1592 = vperm.xlu0 %3331, %v3580_v23   ;;  %3627 = vrcp.f32 %v864_v41  ;;  %v878_v45 = vadd.f32 1.0, %v3600_v42  ;;  %v282_v23 = vld [vmem:[%s5285_s0 + $0x340] sm:$0xff]  ;;  %v2377_v24 = vpack.c.bf16 %v2278_v20, %v2269_v19  ;;  %v253_v42 = vld [vmem:[%s5285_s0 + $0x258] sm:$0xff]  ;;  %v2267_v19 = vld [vmem:[%s4220_s14 + $0x8] sm:$0xff] }
  0xa2   : > { %v3604_v46 = vpop.eup %3603  ;;  %3629 = vrcp.f32 %v879_v43  ;;  %v863_v47 = vadd.f32 1.0, %v3602_v44  ;;  %v3013_v34 = vmul.f32 -1.442695, %v282_v23  ;;  %v2276_v20 = vld [vmem:[%s4220_s14 + $0x50] sm:$0xff] }
  0xa3   : > { %v3606_v48 = vpop.eup %3605  ;;  %3631 = vrcp.f32 %v878_v45  ;;  %v862_v49 = vadd.f32 1.0, %v3604_v46  ;;  %2541 = vmatprep.mubr.bf16.mxu1 %v2377_v24  ;;  %v3028_v45 = vmul.f32 -1.442695, %v297_v35  ;;  %v252_v46 = vld [vmem:[%s5285_s0 + $0x250] sm:$0xff]  ;;  %v2375_v23 = vpack.c.bf16 %v2276_v20, %v2267_v19 }
  0xa4   : > { %v3608_v50 = vpop.eup %3607  ;;  %1587 = vperm.xlu1 %3332, %v3582_v26   ;;  %3633 = vrcp.f32 %v863_v47  ;;  %v849_v51 = vadd.f32 1.0, %v3606_v48  ;;  %v3027_v48 = vmul.f32 -1.442695, %v296_v38 }
  0xa5   : > { %v3610_v52 = vpop.eup %3609  ;;  %1582 = vperm.xlu0 %3331, %v3584_v28   ;;  %3635 = vrcp.f32 %v862_v49  ;;  %v848_v53 = vadd.f32 1.0, %v3608_v50  ;;  %v269_v28 = vld [vmem:[%s5285_s0 + $0x2d8] sm:$0xff]  ;;  %2460 = vmatprep.mubr.bf16.mxu0 %v2375_v23 }
  0xa6   : > { %v3612_v54 = vpop.eup %3611  ;;  %3637 = vrcp.f32 %v849_v51  ;;  %v877_v55 = vadd.f32 1.0, %v3610_v52  ;;  %v3000_v37 = vmul.f32 -1.442695, %v269_v28  ;;  %v281_v49 = vld [vmem:[%s5285_s0 + $0x338] sm:$0xff]  ;;  %v2984_v51 = vmul.f32 -1.442695, %v253_v42 }
  0xa7   : > { %v3614_v56 = vpop.eup %3613  ;;  %v4188_v57 = vpop.permute.xlu1 %1342  ;;  %3639 = vrcp.f32 %v848_v53  ;;  %v876_v58 = vadd.f32 1.0, %v3612_v54  ;;  %v280_v52 = vld [vmem:[%s5285_s0 + $0x330] sm:$0xff]  ;;  %v3012_v59 = vmul.f32 -1.442695, %v281_v49 }
  0xa8   : > { %v3616_v60 = vpop.eup %3615  ;;  %v4193_v61 = vpop.permute.xlu0 %1332  ;;  %1577 = vperm.xlu1 %3332, %v3586_v30   ;;  %3641 = vrcp.f32 %v877_v55  ;;  %v833_v62 = vadd.f32 1.0, %v3614_v56  ;;  %v2983_v55 = vmul.f32 -1.442695, %v252_v46 }
  0xa9   : > { %v3618_v0 = vpop.eup %3617  ;;  %1572 = vperm.xlu0 %3331, %v3588_v32   ;;  %3643 = vrcp.f32 %v876_v58  ;;  %v832_v1 = vadd.f32 1.0, %v3616_v60  ;;  %v268_v32 = vld [vmem:[%s5285_s0 + $0x2d0] sm:$0xff] }
  0xaa   : > { %v3620_v3 = vpop.eup %3619  ;;  %3645 = vrcp.f32 %v833_v62  ;;  %v861_v4 = vadd.f32 1.0, %v3618_v0  ;;  %v2999_v41 = vmul.f32 -1.442695, %v268_v32  ;;  %v3011_v62 = vmul.f32 -1.442695, %v280_v52  ;;  %v294_v52 = vld [vmem:[%s5285_s0 + $0x3a0] sm:$0xff] }
  0xab   : > { %v3622_v7 = vpop.eup %3621  ;;  %v4207_v8 = vpop.permute.xlu1 %1347  ;;  %3647 = vrcp.f32 %v832_v1  ;;  %v860_v9 = vadd.f32 1.0, %v3620_v3 }
  0xac   : > { %v3624_v12 = vpop.eup %3623  ;;  %v4212_v13 = vpop.permute.xlu0 %1337  ;;  %1967 = vperm.xlu1 %3332, %v3622_v7   ;;  %3649 = vrcp.f32 %v861_v4 }
  0xad   : > { %v3626_v16 = vpop.eup %3625  ;;  %1962 = vperm.xlu0 %3331, %v3624_v12   ;;  %3651 = vrcp.f32 %v860_v9 }
  0xae   : > { %v3628_v21 = vpop.eup %3627  ;;  %3653 = vpow2.f32 %v3002_v5 }
  0xaf   : > { %v3630_v25 = vpop.eup %3629  ;;  %v4230_v26 = vpop.permute.xlu1 %1357  ;;  %3655 = vpow2.f32 %v3001_v10 }
  0xb0   : > { %v3632_v29 = vpop.eup %3631  ;;  %v4235_v30 = vpop.permute.xlu0 %1352  ;;  %1887 = vperm.xlu1 %3332, %v3626_v16   ;;  %3657 = vpow2.f32 %v3030_v14 }
  0xb1   : > { %v3634_v33 = vpop.eup %3633  ;;  %1882 = vperm.xlu0 %3331, %v3628_v21   ;;  %3659 = vpow2.f32 %v3029_v17 }
  0xb2   : > { %v3636_v36 = vpop.eup %3635  ;;  %3661 = vpow2.f32 %v2986_v22 }
  0xb3   : > { %v3638_v39 = vpop.eup %3637  ;;  %v4246_v40 = vpop.permute.xlu1 %1367  ;;  %3663 = vpow2.f32 %v2985_v27 }
  0xb4   : > { %v3640_v43 = vpop.eup %3639  ;;  %v4251_v44 = vpop.permute.xlu0 %1362  ;;  %1957 = vperm.xlu1 %3332, %v3630_v25   ;;  %3665 = vpow2.f32 %v3014_v31 }
  0xb5   : > { %v3642_v47 = vpop.eup %3641  ;;  %1952 = vperm.xlu0 %3331, %v3632_v29   ;;  %3667 = vpow2.f32 %v3013_v34 }
  0xb6   : > { %v3644_v50 = vpop.eup %3643  ;;  %3669 = vpow2.f32 %v3000_v37 }
  0xb7   : > { %v3646_v53 = vpop.eup %3645  ;;  %v4262_v54 = vpop.permute.xlu1 %1377  ;;  %3671 = vpow2.f32 %v2999_v41 }
  0xb8   : > { %v3648_v56 = vpop.eup %3647  ;;  %v4264_v58 = vpop.permute.xlu0 %1372  ;;  %1877 = vperm.xlu1 %3332, %v3634_v33   ;;  %3673 = vpow2.f32 %v3028_v45  ;;  %v266_v45 = vld [vmem:[%s5285_s0 + $0x2c0] sm:$0xff] }
  0xb9   : > { %v4266_v60 = vpop.eup %3649  ;;  %1872 = vperm.xlu0 %3331, %v3636_v36   ;;  %3675 = vpow2.f32 %v3027_v48  ;;  %v295_v48 = vld [vmem:[%s5285_s0 + $0x3a8] sm:$0xff] }
  0xba   : > { %v4268_v63 = vpop.eup %3651  ;;  %3677 = vpow2.f32 %v2984_v51 }
  0xbb   : > { %v3654_v0 = vpop.eup %3653  ;;  %v4270_v1 = vpop.permute.xlu1 %1387  ;;  %3679 = vpow2.f32 %v2983_v55 }
  0xbc   : > { %v3656_v2 = vpop.eup %3655  ;;  %v4272_v3 = vpop.permute.xlu0 %1382  ;;  %1807 = vperm.xlu1 %3332, %v3638_v39   ;;  %v847_v4 = vadd.f32 1.0, %v3654_v0  ;;  %3681 = vpow2.f32 %v3012_v59  ;;  %v267_v39 = vld [vmem:[%s5285_s0 + $0x2c8] sm:$0xff]  ;;  %v2997_v59 = vmul.f32 -1.442695, %v266_v45  ;;  %v3026_v0 = vmul.f32 -1.442695, %v295_v48 }
  0xbd   : > { %v3658_v5 = vpop.eup %3657  ;;  %1802 = vperm.xlu0 %3331, %v3640_v43   ;;  %v846_v6 = vadd.f32 1.0, %v3656_v2  ;;  %3683 = vpow2.f32 %v3011_v62  ;;  %v2998_v51 = vmul.f32 -1.442695, %v267_v39  ;;  %v250_v2 = vld [vmem:[%s5285_s0 + $0x240] sm:$0xff] }
  0xbe   : > { %v3660_v7 = vpop.eup %3659  ;;  %3685 = vrcp.f32 %v847_v4  ;;  %v875_v9 = vadd.f32 1.0, %v3658_v5  ;;  %v3025_v5 = vmul.f32 -1.442695, %v294_v52 }
  0xbf   : > { %v3662_v10 = vpop.eup %3661  ;;  %v4274_v11 = vpop.permute.xlu1 %1397  ;;  %3687 = vrcp.f32 %v846_v6  ;;  %v874_v12 = vadd.f32 1.0, %v3660_v7  ;;  %v279_v6 = vld [vmem:[%s5285_s0 + $0x328] sm:$0xff] }
  0xc0   : > { %v3664_v14 = vpop.eup %3663  ;;  %v4276_v15 = vpop.permute.xlu0 %1392  ;;  %1947 = vperm.xlu1 %3332, %v3642_v47   ;;  %3689 = vrcp.f32 %v875_v9  ;;  %v831_v16 = vadd.f32 1.0, %v3662_v10  ;;  %v278_v10 = vld [vmem:[%s5285_s0 + $0x320] sm:$0xff]  ;;  %v3010_v20 = vmul.f32 -1.442695, %v279_v6 }
  0xc1   : > { %v3666_v17 = vpop.eup %3665  ;;  %1942 = vperm.xlu0 %3331, %v3644_v50   ;;  %3691 = vrcp.f32 %v874_v12  ;;  %v830_v18 = vadd.f32 1.0, %v3664_v14  ;;  %v3009_v23 = vmul.f32 -1.442695, %v278_v10 }
  0xc2   : > { %v3668_v21 = vpop.eup %3667  ;;  %3693 = vrcp.f32 %v831_v16  ;;  %v859_v22 = vadd.f32 1.0, %v3666_v17  ;;  %v2981_v16 = vmul.f32 -1.442695, %v250_v2  ;;  %v265_v17 = vld [vmem:[%s5285_s0 + $0x2b8] sm:$0xff] }
  0xc3   : > { %v3670_v24 = vpop.eup %3669  ;;  %v4280_v25 = vpop.permute.xlu1 %1407  ;;  %3695 = vrcp.f32 %v830_v18  ;;  %v858_v27 = vadd.f32 1.0, %v3668_v21  ;;  %v264_v21 = vld [vmem:[%s5285_s0 + $0x2b0] sm:$0xff] }
  0xc4   : > { %v3672_v28 = vpop.eup %3671  ;;  %v4282_v29 = vpop.permute.xlu0 %1402  ;;  %1727 = vperm.xlu1 %3332, %v3646_v53   ;;  %3697 = vrcp.f32 %v859_v22  ;;  %v845_v31 = vadd.f32 1.0, %v3670_v24  ;;  %v293_v24 = vld [vmem:[%s5285_s0 + $0x398] sm:$0xff] }
  0xc5   : > { %v3674_v32 = vpop.eup %3673  ;;  %1722 = vperm.xlu0 %3331, %v3648_v56   ;;  %3699 = vrcp.f32 %v858_v27  ;;  %v844_v33 = vadd.f32 1.0, %v3672_v28  ;;  %v2996_v28 = vmul.f32 -1.442695, %v265_v17  ;;  %v3024_v39 = vmul.f32 -1.442695, %v293_v24 }
  0xc6   : > { %v3676_v34 = vpop.eup %3675  ;;  %3701 = vrcp.f32 %v845_v31  ;;  %v873_v35 = vadd.f32 1.0, %v3674_v32  ;;  %v292_v31 = vld [vmem:[%s5285_s0 + $0x390] sm:$0xff] }
  0xc7   : > { %v3678_v36 = vpop.eup %3677  ;;  %v4284_v37 = vpop.permute.xlu1 %1417  ;;  %3703 = vrcp.f32 %v844_v33  ;;  %v872_v38 = vadd.f32 1.0, %v3676_v34  ;;  %v2995_v34 = vmul.f32 -1.442695, %v264_v21  ;;  %v3023_v45 = vmul.f32 -1.442695, %v292_v31  ;;  %v1215_v31 = vld [vmem:[%s5286_s1 + $0xe8] sm:$0xff] }
  0xc8   : > { %v3680_v41 = vpop.eup %3679  ;;  %v4289_v42 = vpop.permute.xlu0 %1412  ;;  %1867 = vperm.xlu1 %3332, %v4266_v60   ;;  %3705 = vrcp.f32 %v873_v35  ;;  %v829_v43 = vadd.f32 1.0, %v3678_v36  ;;  %v251_v60 = vld [vmem:[%s5285_s0 + $0x248] sm:$0xff]  ;;  %v249_v35 = vld [vmem:[%s5285_s0 + $0x238] sm:$0xff] }
  0xc9   : > { %v3682_v46 = vpop.eup %3681  ;;  %1862 = vperm.xlu0 %3331, %v4268_v63   ;;  %3707 = vrcp.f32 %v872_v38  ;;  %v828_v47 = vadd.f32 1.0, %v3680_v41  ;;  %v2982_v9 = vmul.f32 -1.442695, %v251_v60  ;;  %v248_v41 = vld [vmem:[%s5285_s0 + $0x230] sm:$0xff]  ;;  %v2980_v48 = vmul.f32 -1.442695, %v249_v35 }
  0xca   : > { %v3684_v49 = vpop.eup %3683  ;;  %3709 = vrcp.f32 %v829_v43  ;;  %v857_v50 = vadd.f32 1.0, %v3682_v46  ;;  %v277_v46 = vld [vmem:[%s5285_s0 + $0x318] sm:$0xff]  ;;  %v2979_v52 = vmul.f32 -1.442695, %v248_v41 }
  0xcb   : > { %v3686_v53 = vpop.eup %3685  ;;  %v4302_v55 = vpop.permute.xlu1 %1427  ;;  %3711 = vrcp.f32 %v828_v47  ;;  %v856_v56 = vadd.f32 1.0, %v3684_v49  ;;  %v276_v49 = vld [vmem:[%s5285_s0 + $0x310] sm:$0xff] }
  0xcc   : > { %v3688_v62 = vpop.eup %3687  ;;  %v4307_v63 = vpop.permute.xlu0 %1422  ;;  %1797 = vperm.xlu1 %3332, %v3686_v53   ;;  %3713 = vrcp.f32 %v857_v50 }
  0xcd   : > { %v3690_v4 = vpop.eup %3689  ;;  %1792 = vperm.xlu0 %3331, %v3688_v62   ;;  %3715 = vrcp.f32 %v856_v56  ;;  %v3007_v62 = vmul.f32 -1.442695, %v276_v49 }
  0xce   : > { %v3692_v7 = vpop.eup %3691  ;;  %3717 = vpow2.f32 %v2998_v51 }
  0xcf   : > { %v3694_v12 = vpop.eup %3693  ;;  %v4318_v14 = vpop.permute.xlu1 %1437  ;;  %3719 = vpow2.f32 %v2997_v59  ;;  %v3008_v59 = vmul.f32 -1.442695, %v277_v46 }
  0xd0   : > { %v3696_v18 = vpop.eup %3695  ;;  %v4323_v19 = vpop.permute.xlu0 %1432  ;;  %1937 = vperm.xlu1 %3332, %v3690_v4   ;;  %3721 = vpow2.f32 %v3026_v0 }
  0xd1   : > { %v3698_v22 = vpop.eup %3697  ;;  %1932 = vperm.xlu0 %3331, %v3692_v7   ;;  %3723 = vpow2.f32 %v3025_v5 }
  0xd2   : > { %v3700_v27 = vpop.eup %3699  ;;  %3725 = vpow2.f32 %v2982_v9 }
  0xd3   : > { %v3702_v32 = vpop.eup %3701  ;;  %v4334_v33 = vpop.permute.xlu1 %1447  ;;  %3727 = vpow2.f32 %v2981_v16 }
  0xd4   : > { %v3704_v36 = vpop.eup %3703  ;;  %v4339_v38 = vpop.permute.xlu0 %1442  ;;  %1717 = vperm.xlu1 %3332, %v3694_v12   ;;  %3729 = vpow2.f32 %v3010_v20 }
  0xd5   : > { %v3706_v43 = vpop.eup %3705  ;;  %1712 = vperm.xlu0 %3331, %v3696_v18   ;;  %3731 = vpow2.f32 %v3009_v23  ;;  %v1200_v23 = vld [vmem:[%s5286_s1 + $0x70] sm:$0xff] }
  0xd6   : > { %v3708_v47 = vpop.eup %3707  ;;  %3733 = vpow2.f32 %v2996_v28 }
  0xd7   : > { %v4350_v50 = vpop.eup %3709  ;;  %v4352_v51 = vpop.permute.xlu1 %1457  ;;  %3735 = vpow2.f32 %v2995_v34 }
  0xd8   : > { %v4354_v53 = vpop.eup %3711  ;;  %v4356_v56 = vpop.permute.xlu0 %1452  ;;  %1857 = vperm.xlu1 %3332, %v3698_v22   ;;  %3737 = vpow2.f32 %v3024_v39  ;;  %v1201_v22 = vld [vmem:[%s5286_s1 + $0x78] sm:$0xff]  ;;  %v1216_v39 = vld [vmem:[%s5286_s1 + $0xf0] sm:$0xff] }
  0xd9   : > { %v4358_v60 = vpop.eup %3713  ;;  %1852 = vperm.xlu0 %3331, %v3700_v27   ;;  %3739 = vpow2.f32 %v3023_v45  ;;  %v1199_v45 = vld [vmem:[%s5286_s1 + $0x68] sm:$0xff]  ;;  %v2065_v46 = vmul.f32 %v4280_v25, %v1201_v22 }
  0xda   : > { %v4360_v0 = vpop.eup %3715  ;;  %3741 = vpow2.f32 %v2980_v48 }
  0xdb   : > { %v3718_v2 = vpop.eup %3717  ;;  %v4362_v4 = vpop.permute.xlu1 %1467  ;;  %3743 = vpow2.f32 %v2979_v52  ;;  %v263_v52 = vld [vmem:[%s5285_s0 + $0x2a8] sm:$0xff] }
  0xdc   : > { %v3720_v5 = vpop.eup %3719  ;;  %v4364_v6 = vpop.permute.xlu0 %1462  ;;  %1787 = vperm.xlu1 %3332, %v3702_v32   ;;  %v843_v7 = vadd.f32 1.0, %v3718_v2  ;;  %3745 = vpow2.f32 %v3008_v59  ;;  %v1217_v32 = vld [vmem:[%s5286_s1 + $0xf8] sm:$0xff] }
  0xdd   : > { %v3722_v9 = vpop.eup %3721  ;;  %1782 = vperm.xlu0 %3331, %v3704_v36   ;;  %v842_v10 = vadd.f32 1.0, %v3720_v5  ;;  %3747 = vpow2.f32 %v3007_v62  ;;  %v1214_v36 = vld [vmem:[%s5286_s1 + $0xe0] sm:$0xff] }
  0xde   : > { %v3724_v12 = vpop.eup %3723  ;;  %3749 = vrcp.f32 %v843_v7  ;;  %v871_v16 = vadd.f32 1.0, %v3722_v9  ;;  %v1198_v62 = vld [vmem:[%s5286_s1 + $0x60] sm:$0xff]  ;;  %v1213_v9 = vld [vmem:[%s5286_s1 + $0xd8] sm:$0xff] }
  0xdf   : > { %v3726_v17 = vpop.eup %3725  ;;  %v1478_v18 = vpop.permute.xlu1 %1477  ;;  %3751 = vrcp.f32 %v842_v10  ;;  %v870_v20 = vadd.f32 1.0, %v3724_v12 }
  0xe0   : > { %v3728_v21 = vpop.eup %3727  ;;  %v1473_v24 = vpop.permute.xlu0 %1472  ;;  %1927 = vperm.xlu1 %3332, %v3706_v43   ;;  %3753 = vrcp.f32 %v871_v16  ;;  %v827_v27 = vadd.f32 1.0, %v3726_v17  ;;  %v2079_v2 = vmul.f32 %v1478_v18, %v1215_v31  ;;  %v4401_v18 = vmul.f32 %v4274_v11, %v1199_v45  ;;  %v262_v11 = vld [vmem:[%s5285_s0 + $0x2a0] sm:$0xff] }
  0xe1   : > { %v3730_v28 = vpop.eup %3729  ;;  %1922 = vperm.xlu0 %3331, %v3708_v47   ;;  %3755 = vrcp.f32 %v870_v20  ;;  %v826_v34 = vadd.f32 1.0, %v3728_v21  ;;  %v2064_v47 = vmul.f32 %v4282_v29, %v1200_v23  ;;  %v2078_v10 = vmul.f32 %v1473_v24, %v1214_v36  ;;  %v290_v36 = vld [vmem:[%s5285_s0 + $0x380] sm:$0xff] }
  0xe2   : > { %v3732_v35 = vpop.eup %3731  ;;  %3757 = vrcp.f32 %v827_v27  ;;  %v855_v41 = vadd.f32 1.0, %v3730_v28  ;;  %v2994_v21 = vmul.f32 -1.442695, %v263_v52  ;;  %v2062_v23 = vmul.f32 %v4276_v15, %v1198_v62  ;;  %v291_v28 = vld [vmem:[%s5285_s0 + $0x388] sm:$0xff] }
  0xe3   : > { %v3734_v43 = vpop.eup %3733  ;;  %v1488_v48 = vpop.permute.xlu1 %1487  ;;  %3759 = vrcp.f32 %v826_v34  ;;  %v854_v49 = vadd.f32 1.0, %v3732_v35  ;;  %v2201_v15 = vpack.c.bf16 %v2065_v46, %v2064_v47  ;;  %v2208_v45 = vpack.c.bf16 %v2079_v2, %v2078_v10  ;;  %v247_v2 = vld [vmem:[%s5285_s0 + $0x228] sm:$0xff] }
  0xe4   : > { %v3736_v59 = vpop.eup %3735  ;;  %v2081_v5 = vmul.f32 %v1488_v48, %v1217_v32  ;;  %v1483_v7 = vpop.permute.xlu0 %1482  ;;  %1707 = vperm.xlu1 %3332, %v4350_v50   ;;  %3761 = vrcp.f32 %v855_v41  ;;  %v841_v25 = vadd.f32 1.0, %v3734_v43  ;;  %v1212_v50 = vld [vmem:[%s5286_s1 + $0xd0] sm:$0xff]  ;;  %v2077_v32 = vmul.f32 %v4362_v4, %v1213_v9  ;;  %v1197_v41 = vld [vmem:[%s5286_s1 + $0x58] sm:$0xff]  ;;  %v1210_v48 = vld [vmem:[%s5286_s1 + $0xc0] sm:$0xff] }
  0xe5   : > { %v3738_v29 = vpop.eup %3737  ;;  %v2080_v12 = vmul.f32 %v1483_v7, %v1216_v39  ;;  %1702 = vperm.xlu0 %3331, %v4354_v53   ;;  %3763 = vrcp.f32 %v854_v49  ;;  %v840_v16 = vadd.f32 1.0, %v3736_v59  ;;  %v1196_v4 = vld [vmem:[%s5286_s1 + $0x50] sm:$0xff]  ;;  %v2076_v43 = vmul.f32 %v4364_v6, %v1212_v50  ;;  %v246_v7 = vld [vmem:[%s5285_s0 + $0x220] sm:$0xff] }
  0xe6   : > { %v3740_v17 = vpop.eup %3739  ;;  %3765 = vrcp.f32 %v841_v25  ;;  %v869_v20 = vadd.f32 1.0, %v3738_v29  ;;  %v2993_v52 = vmul.f32 -1.442695, %v262_v11  ;;  %v3022_v59 = vmul.f32 -1.442695, %v291_v28 }
  0xe7   : > { %v3742_v22 = vpop.eup %3741  ;;  %v4407_v24 = vpop.permute.xlu1 %1497  ;;  %v2209_v27 = vpack.c.bf16 %v2081_v5, %v2080_v12  ;;  %3767 = vrcp.f32 %v840_v16  ;;  %v868_v53 = vadd.f32 1.0, %v3740_v17  ;;  %v2061_v29 = vmul.f32 %v4270_v1, %v1197_v41  ;;  %v275_v16 = vld [vmem:[%s5285_s0 + $0x308] sm:$0xff]  ;;  %v274_v17 = vld [vmem:[%s5285_s0 + $0x300] sm:$0xff] }
  0xe8   : > { %v3744_v31 = vpop.eup %3743  ;;  %v4416_v34 = vpop.permute.xlu0 %1492  ;;  %1847 = vperm.xlu1 %3332, %v4358_v60   ;;  %3769 = vrcp.f32 %v869_v20  ;;  %v825_v35 = vadd.f32 1.0, %v3742_v22  ;;  %v1211_v60 = vld [vmem:[%s5286_s1 + $0xc8] sm:$0xff]  ;;  %v2060_v9 = vmul.f32 %v4272_v3, %v1196_v4  ;;  %v2200_v10 = vpack.c.bf16 %v4401_v18, %v2062_v23  ;;  %v1194_v3 = vld [vmem:[%s5286_s1 + $0x40] sm:$0xff] }
  0xe9   : > { %v3746_v39 = vpop.eup %3745  ;;  %1842 = vperm.xlu0 %3331, %v4360_v0   ;;  %3055 = vmatprep.subr.bf16.mxu0 %v2209_v27  ;;  %3771 = vrcp.f32 %v868_v53  ;;  %v824_v46 = vadd.f32 1.0, %v3744_v31  ;;  %v3021_v0 = vmul.f32 -1.442695, %v290_v36  ;;  %v1195_v1 = vld [vmem:[%s5286_s1 + $0x48] sm:$0xff]  ;;  %v2075_v18 = vmul.f32 %v4352_v51, %v1211_v60  ;;  %v1209_v27 = vld [vmem:[%s5286_s1 + $0xb8] sm:$0xff]  ;;  %v1208_v53 = vld [vmem:[%s5286_s1 + $0xb0] sm:$0xff] }
  0xea   : > { %v3748_v47 = vpop.eup %3747  ;;  %3056 = vmatpush3.bf16.msra.mxu0 %v2201_v15  ;;  %3773 = vrcp.f32 %v825_v35  ;;  %v853_v49 = vadd.f32 1.0, %v3746_v39  ;;  %v2074_v20 = vmul.f32 %v4356_v56, %v1210_v48  ;;  %v2207_v22 = vpack.c.bf16 %v2077_v32, %v2076_v43  ;;  %v261_v15 = vld [vmem:[%s5285_s0 + $0x298] sm:$0xff]  ;;  %v260_v35 = vld [vmem:[%s5285_s0 + $0x290] sm:$0xff] }
  0xeb   : > { %v3750_v62 = vpop.eup %3749  ;;  %3057 = vmatprep.subr.bf16.mxu0 %v2208_v45  ;;  %v4436_v5 = vpop.permute.xlu1 %1507  ;;  %3775 = vrcp.f32 %v824_v46  ;;  %v852_v6 = vadd.f32 1.0, %v3748_v47  ;;  %v2978_v11 = vmul.f32 -1.442695, %v247_v2  ;;  %v2977_v28 = vmul.f32 -1.442695, %v246_v7  ;;  %v245_v60 = vld [vmem:[%s5285_s0 + $0x218] sm:$0xff] }
  0xec   : > { %v3752_v25 = vpop.eup %3751  ;;  %v4447_v12 = vpop.permute.xlu0 %1502  ;;  %1777 = vperm.xlu1 %3332, %v3750_v62   ;;  %3777 = vrcp.f32 %v853_v49  ;;  %v3006_v56 = vmul.f32 -1.442695, %v275_v16  ;;  %v3005_v32 = vmul.f32 -1.442695, %v274_v17  ;;  %v2058_v39 = vmul.f32 %v4264_v58, %v1194_v3  ;;  %v244_v43 = vld [vmem:[%s5285_s0 + $0x210] sm:$0xff]  ;;  %v259_v7 = vld [vmem:[%s5285_s0 + $0x288] sm:$0xff] }
  0xed   : > { %v3754_v50 = vpop.eup %3753  ;;  %1772 = vperm.xlu0 %3331, %v3752_v25   ;;  %3779 = vrcp.f32 %v852_v6  ;;  %v2199_v41 = vpack.c.bf16 %v2061_v29, %v2060_v9  ;;  %v1192_v58 = vld [vmem:[%s5286_s1 + $0x30] sm:$0xff]  ;;  %v2073_v46 = vmul.f32 %v4334_v33, %v1209_v27  ;;  %v2072_v47 = vmul.f32 %v4339_v38, %v1208_v53  ;;  %v258_v17 = vld [vmem:[%s5285_s0 + $0x280] sm:$0xff] }
  0xee   : > { %v3756_v23 = vpop.eup %3755  ;;  %3058 = vmatpush3.bf16.msra.mxu0 %v2200_v10  ;;  %3781 = vpow2.f32 %v2994_v21  ;;  %v2059_v21 = vmul.f32 %v4262_v54, %v1195_v1  ;;  %v1193_v54 = vld [vmem:[%s5286_s1 + $0x38] sm:$0xff]  ;;  %v2206_v48 = vpack.c.bf16 %v2075_v18, %v2074_v20  ;;  %v2992_v62 = vmul.f32 -1.442695, %v261_v15  ;;  %v1191_v1 = vld [vmem:[%s5286_s1 + $0x28] sm:$0xff] }
  0xef   : > { %v3758_v31 = vpop.eup %3757  ;;  %3059 = vmatprep.subr.bf16.mxu0 %v2207_v22  ;;  %v4469_v51 = vpop.permute.xlu1 %1517  ;;  %3783 = vpow2.f32 %v2993_v52  ;;  %v1207_v52 = vld [vmem:[%s5286_s1 + $0xa8] sm:$0xff]  ;;  %v2991_v6 = vmul.f32 -1.442695, %v260_v35  ;;  %v2976_v38 = vmul.f32 -1.442695, %v245_v60  ;;  %v2057_v29 = vmul.f32 %v4246_v40, %v1193_v54  ;;  %v1190_v40 = vld [vmem:[%s5286_s1 + $0x20] sm:$0xff] }
  0xf0   : > { %v3760_v36 = vpop.eup %3759  ;;  %v4479_v4 = vpop.permute.xlu0 %1512  ;;  %1917 = vperm.xlu1 %3332, %v3754_v50   ;;  %3785 = vpow2.f32 %v3022_v59  ;;  %v1206_v59 = vld [vmem:[%s5286_s1 + $0xa0] sm:$0xff]  ;;  %v2056_v9 = vmul.f32 %v4251_v44, %v1192_v58  ;;  %v2198_v10 = vpack.c.bf16 %v2059_v21, %v2058_v39  ;;  %v2071_v44 = vmul.f32 %v4318_v14, %v1207_v52  ;;  %v1205_v22 = vld [vmem:[%s5286_s1 + $0x98] sm:$0xff]  ;;  %v1187_v58 = vld [vmem:[%s5286_s1 + $0x8] sm:$0xff] }
  0xf1   : > { %v3762_v45 = vpop.eup %3761  ;;  %1912 = vperm.xlu0 %3331, %v3756_v23   ;;  %3787 = vpow2.f32 %v3021_v0  ;;  %v2975_v0 = vmul.f32 -1.442695, %v244_v43  ;;  %v2070_v3 = vmul.f32 %v4323_v19, %v1206_v59  ;;  %v2205_v18 = vpack.c.bf16 %v2073_v46, %v2072_v47  ;;  %v1204_v23 = vld [vmem:[%s5286_s1 + $0x90] sm:$0xff]  ;;  %v1202_v21 = vld [vmem:[%s5286_s1 + $0x80] sm:$0xff] }
  0xf2   : > { %v3764_v49 = vpop.eup %3763  ;;  %3060 = vmatpush3.bf16.msra.mxu0 %v2199_v41  ;;  %3789 = vpow2.f32 %v2978_v11  ;;  %v2990_v27 = vmul.f32 -1.442695, %v259_v7  ;;  %v2989_v19 = vmul.f32 -1.442695, %v258_v17  ;;  %v2069_v39 = vmul.f32 %v4302_v55, %v1205_v22  ;;  %v1188_v43 = vld [vmem:[%s5286_s1 + $0x10] sm:$0xff]  ;;  %v243_v55 = vld [vmem:[%s5285_s0 + $0x208] sm:$0xff] }
  0xf3   : > { %v4501_v2 = vpop.eup %3765  ;;  %3061 = vmatprep.subr.bf16.mxu0 %v2206_v48  ;;  %v4503_v33 = vpop.permute.xlu1 %1527  ;;  %3791 = vpow2.f32 %v2977_v28  ;;  %v1189_v28 = vld [vmem:[%s5286_s1 + $0x18] sm:$0xff]  ;;  %v2066_v48 = vmul.f32 %v4289_v42, %v1202_v21  ;;  %v242_v52 = vld [vmem:[%s5285_s0 + $0x200] sm:$0xff]  ;;  %v2974_v7 = vmul.f32 -1.442695, %v243_v55 }
  0xf4   : > { %v4508_v25 = vpop.eup %3767  ;;  %v4512_v16 = vpop.permute.xlu0 %1522  ;;  %1697 = vperm.xlu1 %3332, %v3758_v31   ;;  %3793 = vpow2.f32 %v3006_v56  ;;  %v2055_v31 = vmul.f32 %v4230_v26, %v1191_v1  ;;  %v2054_v56 = vmul.f32 %v4235_v30, %v1190_v40  ;;  %v2068_v26 = vmul.f32 %v4307_v63, %v1204_v23  ;;  %v1249_v42 = vld [vmem:[%s5286_s1 + $0x1f8] sm:$0xff] }
  0xf5   : > { %v4517_v50 = vpop.eup %3769  ;;  %1692 = vperm.xlu0 %3331, %v3760_v36   ;;  %3795 = vpow2.f32 %v3005_v32  ;;  %v2197_v32 = vpack.c.bf16 %v2057_v29, %v2056_v9  ;;  %v1203_v36 = vld [vmem:[%s5286_s1 + $0x88] sm:$0xff]  ;;  %v2204_v30 = vpack.c.bf16 %v2071_v44, %v2070_v3  ;;  %v2051_v9 = vmul.f32 %v4212_v13, %v1187_v58 }
  0xf6   : > { %v4527_v20 = vpop.eup %3771  ;;  %3062 = vmatpush3.bf16.msra.mxu0 %v2198_v10  ;;  %3797 = vpow2.f32 %v2992_v62  ;;  %v2196_v46 = vpack.c.bf16 %v2055_v31, %v2054_v56  ;;  %v2067_v47 = vmul.f32 %v4284_v37, %v1203_v36  ;;  %v2203_v62 = vpack.c.bf16 %v2069_v39, %v2068_v26  ;;  %v1248_v37 = vld [vmem:[%s5286_s1 + $0x1f0] sm:$0xff]  ;;  %v2275_v39 = vld [vmem:[%s4220_s14 + $0x48] sm:$0xff] }
  0xf7   : > { %v4535_v53 = vpop.eup %3773  ;;  %3063 = vmatprep.subr.bf16.mxu0 %v2205_v18  ;;  %v4537_v14 = vpop.permute.xlu1 %1537  ;;  %3799 = vpow2.f32 %v2991_v6  ;;  %v2973_v17 = vmul.f32 -1.442695, %v242_v52  ;;  %v1232_v31 = vld [vmem:[%s5286_s1 + $0x170] sm:$0xff] }
  0xf8   : > { %v4539_v11 = vpop.eup %3775  ;;  %v4546_v15 = vpop.permute.xlu0 %1532  ;;  %1837 = vperm.xlu1 %3332, %v3762_v45   ;;  %3801 = vpow2.f32 %v2976_v38  ;;  %v2053_v45 = vmul.f32 %v4207_v8, %v1189_v28  ;;  %v2202_v44 = vpack.c.bf16 %v2067_v47, %v2066_v48  ;;  %v1246_v48 = vld [vmem:[%s5286_s1 + $0x1e0] sm:$0xff] }
  0xf9   : > { %v4548_v35 = vpop.eup %3777  ;;  %1832 = vperm.xlu0 %3331, %v3764_v49   ;;  %3803 = vpow2.f32 %v2975_v0  ;;  %v2052_v0 = vmul.f32 %v4188_v57, %v1188_v43 }
  0xfa   : > { %v4558_v41 = vpop.eup %3779  ;;  %3064 = vmatpush3.bf16.msra.mxu0 %v2197_v32  ;;  %3805 = vpow2.f32 %v2990_v27 }
  0xfb   : > { %v3782_v60 = vpop.eup %3781  ;;  %3065 = vmatprep.subr.bf16.mxu0 %v2204_v30  ;;  %v1643_v54 = vpop.permute.xlu1 %1642  ;;  %3807 = vpow2.f32 %v2989_v19  ;;  %v2195_v40 = vpack.c.bf16 %v2053_v45, %v2052_v0  ;;  %v2285_v45 = vld [vmem:[%s4220_s14 + $0x98] sm:$0xff] }
  0xfc   : > { %v3784_v63 = vpop.eup %3783  ;;  %v4572_v49 = vpop.permute.xlu0 %1542  ;;  %1767 = vperm.xlu1 %3332, %v4501_v2   ;;  %v839_v8 = vadd.f32 1.0, %v3782_v60  ;;  %v2112_v23 = vmul.f32 %v1643_v54, %v1248_v37  ;;  %v2294_v54 = vld [vmem:[%s4220_s14 + $0xe0] sm:$0xff] }
  0xfd   : > { %v3786_v59 = vpop.eup %3785  ;;  %1762 = vperm.xlu0 %3331, %v4508_v25   ;;  %v838_v6 = vadd.f32 1.0, %v3784_v63  ;;  %v1186_v25 = vld [vmem:[%s5286_s1] sm:$0xff]  ;;  %v2384_v0 = vpack.c.bf16 %v2294_v54, %v2285_v45 }
  0xfe   : > { %v3788_v38 = vpop.eup %3787  ;;  %3066 = vmatpush3.bf16.msra.mxu0 %v2196_v46  ;;  %3809 = vrcp.f32 %v839_v8  ;;  %v867_v2 = vadd.f32 1.0, %v3786_v59  ;;  %v2050_v28 = vmul.f32 %v4193_v61, %v1186_v25  ;;  %v2266_v61 = vld [vmem:[%s4220_s14] sm:$0xff] }
  0xff   : > { %v3790_v29 = vpop.eup %3789  ;;  %3067 = vmatprep.subr.bf16.mxu0 %v2203_v62  ;;  %v1563_v57 = vpop.permute.xlu1 %1562  ;;  %3811 = vrcp.f32 %v838_v6  ;;  %v866_v10 = vadd.f32 1.0, %v3788_v38  ;;  %v2374_v52 = vpack.c.bf16 %v2275_v39, %v2266_v61  ;;  %v321_v38 = vld [vmem:[%s5285_s0 + $0x478] sm:$0xff]  ;;  %v315_v39 = vld [vmem:[%s5285_s0 + $0x448] sm:$0xff]  ;;  %v314_v45 = vld [vmem:[%s5285_s0 + $0x440] sm:$0xff] }
 0x100   : > { %v3792_v1 = vpop.eup %3791  ;;  %v1648_v3 = vpop.permute.xlu0 %1647  ;;  %1907 = vperm.xlu1 %3332, %v4517_v50   ;;  %3813 = vrcp.f32 %v867_v2  ;;  %v823_v18 = vadd.f32 1.0, %v3790_v29  ;;  %v1233_v50 = vld [vmem:[%s5286_s1 + $0x178] sm:$0xff]  ;;  %v2194_v30 = vpack.c.bf16 %v2051_v9, %v2050_v28  ;;  %v2096_v63 = vmul.f32 %v1563_v57, %v1232_v31  ;;  %v319_v57 = vld [vmem:[%s5285_s0 + $0x468] sm:$0xff]  ;;  %v316_v28 = vld [vmem:[%s5285_s0 + $0x450] sm:$0xff] }
 0x101   : > { %v3794_v22 = vpop.eup %3793  ;;  %v2113_v27 = vmul.f32 %v1648_v3, %v1249_v42  ;;  %1902 = vperm.xlu0 %3331, %v4527_v20   ;;  %3815 = vrcp.f32 %v866_v10  ;;  %v822_v13 = vadd.f32 1.0, %v3792_v1  ;;  %v1231_v10 = vld [vmem:[%s5286_s1 + $0x168] sm:$0xff] }
 0x102   : > { %v3796_v19 = vpop.eup %3795  ;;  %3068 = vmatpush3.bf16.msra.mxu0 %v2195_v40  ;;  %v851_v56 = vadd.f32 1.0, %v3794_v22  ;;  %3817 = vpow2.f32 %v2974_v7  ;;  %v320_v7 = vld [vmem:[%s5285_s0 + $0x470] sm:$0xff]  ;;  %v2303_v31 = vld [vmem:[%s4220_s14 + $0x128] sm:$0xff] }
 0x103   : > { %v3798_v20 = vpop.eup %3797  ;;  %3069 = vmatprep.subr.bf16.mxu0 %v2202_v44  ;;  %v1633_v32 = vpop.permute.xlu1 %1632  ;;  %v2225_v36 = vpack.c.bf16 %v2113_v27, %v2112_v23  ;;  %v850_v21 = vadd.f32 1.0, %v3796_v19  ;;  %3819 = vpow2.f32 %v2973_v17  ;;  %v3052_v17 = vmul.f32 -1.442695, %v321_v38  ;;  %v2284_v22 = vld [vmem:[%s4220_s14 + $0x90] sm:$0xff]  ;;  %v2293_v23 = vld [vmem:[%s4220_s14 + $0xd8] sm:$0xff]  ;;  %v1226_v38 = vld [vmem:[%s5286_s1 + $0x140] sm:$0xff] }
 0x104   : > { %v3800_v26 = vpop.eup %3799  ;;  %v1568_v60 = vpop.permute.xlu0 %1567  ;;  %1687 = vperm.xlu1 %3332, %v4535_v53   ;;  %3821 = vrcp.f32 %v823_v18  ;;  %v837_v43 = vadd.f32 1.0, %v3798_v20  ;;  %v1247_v53 = vld [vmem:[%s5286_s1 + $0x1e8] sm:$0xff]  ;;  %v2110_v29 = vmul.f32 %v1633_v32, %v1246_v48  ;;  %v3051_v3 = vmul.f32 -1.442695, %v320_v7  ;;  %v317_v18 = vld [vmem:[%s5285_s0 + $0x458] sm:$0xff]  ;;  %v1228_v20 = vld [vmem:[%s5286_s1 + $0x150] sm:$0xff] }
 0x105   : > { %v3802_v55 = vpop.eup %3801  ;;  %v2097_v58 = vmul.f32 %v1568_v60, %v1233_v50  ;;  %1682 = vperm.xlu0 %3331, %v4539_v11   ;;  %3107 = vmatprep.subr.bf16.mxu1 %v2225_v36  ;;  %3823 = vrcp.f32 %v822_v13  ;;  %v836_v46 = vadd.f32 1.0, %v3800_v26  ;;  %v3050_v19 = vmul.f32 -1.442695, %v319_v57  ;;  %v2312_v50 = vld [vmem:[%s4220_s14 + $0x170] sm:$0xff]  ;;  %v1245_v60 = vld [vmem:[%s5286_s1 + $0x1d8] sm:$0xff]  ;;  %v311_v57 = vld [vmem:[%s5285_s0 + $0x428] sm:$0xff] }
 0x106   : > { %v3804_v47 = vpop.eup %3803  ;;  %3070 = vmatpush3.bf16.msra.mxu0 %v2194_v30  ;;  %3825 = vrcp.f32 %v851_v56  ;;  %v821_v8 = vadd.f32 1.0, %v3802_v55  ;;  %v1244_v30 = vld [vmem:[%s5286_s1 + $0x1d0] sm:$0xff]  ;;  %v2383_v54 = vpack.c.bf16 %v2293_v23, %v2284_v22  ;;  %v1225_v23 = vld [vmem:[%s5286_s1 + $0x138] sm:$0xff] }
 0x107   : > { %v3806_v59 = vpop.eup %3805  ;;  %v1553_v62 = vpop.permute.xlu1 %1552  ;;  %v2217_v6 = vpack.c.bf16 %v2097_v58, %v2096_v63  ;;  %3827 = vrcp.f32 %v850_v21  ;;  %v820_v11 = vadd.f32 1.0, %v3804_v47  ;;  %v1229_v21 = vld [vmem:[%s5286_s1 + $0x158] sm:$0xff]  ;;  %v2393_v47 = vpack.c.bf16 %v2312_v50, %v2303_v31  ;;  %v2330_v50 = vld [vmem:[%s4220_s14 + $0x200] sm:$0xff] }
 0x108   : > { %v3808_v37 = vpop.eup %3807  ;;  %v1638_v42 = vpop.permute.xlu0 %1637  ;;  %1827 = vperm.xlu1 %3332, %v4548_v35   ;;  %3829 = vrcp.f32 %v837_v43  ;;  %v835_v2 = vadd.f32 1.0, %v3806_v59  ;;  %v1230_v35 = vld [vmem:[%s5286_s1 + $0x160] sm:$0xff]  ;;  %v3048_v43 = vmul.f32 -1.442695, %v317_v18  ;;  %v2311_v18 = vld [vmem:[%s4220_s14 + $0x168] sm:$0xff]  ;;  %v2321_v31 = vld [vmem:[%s4220_s14 + $0x1b8] sm:$0xff] }
 0x109   : > { %v2111_v25 = vmul.f32 %v1638_v42, %v1247_v53  ;;  %1822 = vperm.xlu0 %3331, %v4558_v41   ;;  %3108 = vmatpush3.bf16.msra.mxu1 %v2217_v6  ;;  %3831 = vrcp.f32 %v836_v46  ;;  %v834_v9 = vadd.f32 1.0, %v3808_v37  ;;  %v318_v41 = vld [vmem:[%s5285_s0 + $0x460] sm:$0xff]  ;;  %v2094_v32 = vmul.f32 %v1553_v62, %v1230_v35  ;;  %v1227_v53 = vld [vmem:[%s5286_s1 + $0x148] sm:$0xff]  ;;  %v313_v6 = vld [vmem:[%s5285_s0 + $0x438] sm:$0xff] }
 0x10a   : > { %3833 = vrcp.f32 %v821_v8  ;;  %2461 = vmatmul.mubr.bf16.vlgmr.msra.gmra.mxu0 %v2374_v52  ;;  %v3049_v61 = vmul.f32 -1.442695, %v318_v41  ;;  %v3047_v46 = vmul.f32 -1.442695, %v316_v28  ;;  %v2092_v8 = vmul.f32 %v4572_v49, %v1228_v20  ;;  %v1243_v49 = vld [vmem:[%s5286_s1 + $0x1c8] sm:$0xff]  ;;  %v1242_v42 = vld [vmem:[%s5286_s1 + $0x1c0] sm:$0xff] }
 0x10b   : > { %v3810_v1 = vpop.eup %3809  ;;  %v2224_v40 = vpack.c.bf16 %v2111_v25, %v2110_v29  ;;  %v1623_v44 = vpop.permute.xlu1 %1622  ;;  %3835 = vrcp.f32 %v820_v11  ;;  %2468 = vmatprep.mubr.bf16.mxu0 %v2384_v0  ;;  %v3046_v62 = vmul.f32 -1.442695, %v315_v39  ;;  %v310_v35 = vld [vmem:[%s5285_s0 + $0x420] sm:$0xff]  ;;  %v1224_v20 = vld [vmem:[%s5286_s1 + $0x130] sm:$0xff] }
 0x10c   : > { %v3812_v27 = vpop.eup %3811  ;;  %v1558_v13 = vpop.permute.xlu0 %1557  ;;  %1757 = vperm.xlu1 %3332, %v3810_v1   ;;  %3837 = vrcp.f32 %v835_v2  ;;  %v2108_v0 = vmul.f32 %v1623_v44, %v1244_v30  ;;  %v3045_v2 = vmul.f32 -1.442695, %v314_v45  ;;  %v309_v44 = vld [vmem:[%s5285_s0 + $0x418] sm:$0xff]  ;;  %v3041_v39 = vmul.f32 -1.442695, %v310_v35  ;;  %v308_v30 = vld [vmem:[%s5285_s0 + $0x410] sm:$0xff] }
 0x10d   : > { %v3814_v56 = vpop.eup %3813  ;;  %v2095_v36 = vmul.f32 %v1558_v13, %v1231_v10  ;;  %1752 = vperm.xlu0 %3331, %v3812_v27   ;;  %3109 = vmatprep.subr.bf16.mxu1 %v2224_v40  ;;  %3839 = vrcp.f32 %v834_v9  ;;  %v312_v9 = vld [vmem:[%s5285_s0 + $0x430] sm:$0xff]  ;;  %v3044_v40 = vmul.f32 -1.442695, %v313_v6  ;;  %v2091_v27 = vmul.f32 %v4537_v14, %v1227_v53  ;;  %v1241_v14 = vld [vmem:[%s5286_s1 + $0x1b8] sm:$0xff] }
 0x10e   : > { %v3816_v26 = vpop.eup %3815  ;;  %3841 = vpow2.f32 %v3052_v17  ;;  %v2090_v13 = vmul.f32 %v4546_v15, %v1226_v38  ;;  %v3043_v15 = vmul.f32 -1.442695, %v312_v9  ;;  %v2089_v45 = vmul.f32 %v4503_v33, %v1225_v23  ;;  %v1222_v33 = vld [vmem:[%s5286_s1 + $0x120] sm:$0xff]  ;;  %v2320_v35 = vld [vmem:[%s4220_s14 + $0x1b0] sm:$0xff]  ;;  %v1237_v23 = vld [vmem:[%s5286_s1 + $0x198] sm:$0xff] }
 0x10f   : > { %v3818_v55 = vpop.eup %3817  ;;  %v2216_v63 = vpack.c.bf16 %v2095_v36, %v2094_v32  ;;  %v1548_v58 = vpop.permute.xlu1 %1547  ;;  %3843 = vpow2.f32 %v3051_v3  ;;  %v2302_v3 = vld [vmem:[%s4220_s14 + $0x120] sm:$0xff]  ;;  %v3042_v36 = vmul.f32 -1.442695, %v311_v57  ;;  %v2088_v53 = vmul.f32 %v4512_v16, %v1224_v20  ;;  %v1221_v16 = vld [vmem:[%s5286_s1 + $0x118] sm:$0xff] }
 0x110   : > { %v3820_v48 = vpop.eup %3819  ;;  %v2093_v52 = vmul.f32 %v1548_v58, %v1229_v21  ;;  %v1628_v59 = vpop.permute.xlu0 %1627  ;;  %1897 = vperm.xlu1 %3332, %v3814_v56   ;;  %3845 = vpow2.f32 %v3050_v19  ;;  %v819_v25 = vadd.f32 1.0, %v3818_v55  ;;  %v306_v58 = vld [vmem:[%s5285_s0 + $0x400] sm:$0xff]  ;;  %v3039_v38 = vmul.f32 -1.442695, %v308_v30 }
 0x111   : > { %v3822_v11 = vpop.eup %3821  ;;  %v2109_v37 = vmul.f32 %v1628_v59, %v1245_v60  ;;  %1892 = vperm.xlu0 %3331, %v3816_v26   ;;  %3110 = vmatpush3.bf16.msra.mxu1 %v2216_v63  ;;  %3847 = vpow2.f32 %v3049_v61  ;;  %v818_v1 = vadd.f32 1.0, %v3820_v48  ;;  %v1240_v61 = vld [vmem:[%s5286_s1 + $0x1b0] sm:$0xff]  ;;  %v3040_v26 = vmul.f32 -1.442695, %v309_v44  ;;  %v307_v63 = vld [vmem:[%s5285_s0 + $0x408] sm:$0xff] }
 0x112   : > { %v3824_v7 = vpop.eup %3823  ;;  %v2215_v29 = vpack.c.bf16 %v2093_v52, %v2092_v8  ;;  %3849 = vpow2.f32 %v3048_v43  ;;  %2469 = vmatmul.mubr.bf16.gmra.mxu0 %v2383_v54  ;;  %v2392_v60 = vpack.c.bf16 %v2311_v18, %v2302_v3  ;;  %v1223_v48 = vld [vmem:[%s5286_s1 + $0x128] sm:$0xff]  ;;  %v2214_v8 = vpack.c.bf16 %v2091_v27, %v2090_v13  ;;  %v2348_v18 = vld [vmem:[%s4220_s14 + $0x290] sm:$0xff] }
 0x113   : > { %v3826_v10 = vpop.eup %3825  ;;  %v2223_v17 = vpack.c.bf16 %v2109_v37, %v2108_v0  ;;  %v1618_v41 = vpop.permute.xlu1 %1617  ;;  %3851 = vpow2.f32 %v3047_v46  ;;  %2476 = vmatprep.mubr.bf16.mxu0 %v2393_v47  ;;  %v2402_v46 = vpack.c.bf16 %v2330_v50, %v2321_v31  ;;  %v1238_v37 = vld [vmem:[%s5286_s1 + $0x1a0] sm:$0xff]  ;;  %v2339_v3 = vld [vmem:[%s4220_s14 + $0x248] sm:$0xff] }
 0x114   : > { %v3828_v22 = vpop.eup %3827  ;;  %v2107_v19 = vmul.f32 %v1618_v41, %v1243_v49  ;;  %v1613_v28 = vpop.permute.xlu0 %1612  ;;  %1677 = vperm.xlu1 %3332, %v3822_v11   ;;  %3853 = vpow2.f32 %v3046_v62  ;;  %v1239_v11 = vld [vmem:[%s5286_s1 + $0x1a8] sm:$0xff]  ;;  %v3038_v49 = vmul.f32 -1.442695, %v307_v63  ;;  %v2213_v41 = vpack.c.bf16 %v2089_v45, %v2088_v53 }
 0x115   : > { %v3830_v56 = vpop.eup %3829  ;;  %v2106_v32 = vmul.f32 %v1613_v28, %v1242_v42  ;;  %1672 = vperm.xlu0 %3331, %v3824_v7   ;;  %3111 = vmatprep.subr.bf16.mxu1 %v2223_v17  ;;  %3855 = vpow2.f32 %v3045_v2  ;;  %v4739_v42 = vmul.f32 -1.442695, %v306_v58  ;;  %v1220_v7 = vld [vmem:[%s5286_s1 + $0x110] sm:$0xff]  ;;  %v1235_v45 = vld [vmem:[%s5286_s1 + $0x188] sm:$0xff] }
 0x116   : > { %v3832_v21 = vpop.eup %3831  ;;  %3112 = vmatpush3.bf16.msra.mxu1 %v2215_v29  ;;  %3857 = vrcp.f32 %v819_v25  ;;  %v2087_v29 = vmul.f32 %v4469_v51, %v1223_v48  ;;  %v2086_v25 = vmul.f32 %v4479_v4, %v1222_v33  ;;  %v4751_v51 = vmul.f32 %v4436_v5, %v1221_v16  ;;  %v1236_v28 = vld [vmem:[%s5286_s1 + $0x190] sm:$0xff]  ;;  %v2338_v33 = vld [vmem:[%s4220_s14 + $0x240] sm:$0xff]  ;;  %v2347_v53 = vld [vmem:[%s4220_s14 + $0x288] sm:$0xff] }
 0x117   : > { %v4708_v43 = vpop.eup %3833  ;;  %v2222_v54 = vpack.c.bf16 %v2107_v19, %v2106_v32  ;;  %v1608_v55 = vpop.permute.xlu1 %1607  ;;  %3859 = vrcp.f32 %v818_v1  ;;  %v2084_v19 = vmul.f32 %v4447_v12, %v1220_v7  ;;  %v1218_v12 = vld [vmem:[%s5286_s1 + $0x100] sm:$0xff] }
 0x118   : > { %v4717_v47 = vpop.eup %3835  ;;  %v2105_v52 = vmul.f32 %v1608_v55, %v1241_v14  ;;  %v1603_v59 = vpop.permute.xlu0 %1602  ;;  %1817 = vperm.xlu1 %3332, %v3826_v10   ;;  %3861 = vpow2.f32 %v3044_v40  ;;  %v2329_v10 = vld [vmem:[%s4220_s14 + $0x1f8] sm:$0xff]  ;;  %v2411_v14 = vpack.c.bf16 %v2348_v18, %v2339_v3 }
 0x119   : > { %v4726_v62 = vpop.eup %3837  ;;  %v2104_v6 = vmul.f32 %v1603_v59, %v1240_v61  ;;  %1812 = vperm.xlu0 %3331, %v3828_v22   ;;  %3113 = vmatprep.subr.bf16.mxu1 %v2222_v54  ;;  %3863 = vpow2.f32 %v3043_v15  ;;  %v2401_v31 = vpack.c.bf16 %v2329_v10, %v2320_v35 }
 0x11a   : > { %v4731_v0 = vpop.eup %3839  ;;  %3114 = vmatpush3.bf16.msra.mxu1 %v2214_v8  ;;  %3865 = vpow2.f32 %v3042_v36  ;;  %2477 = vmatmul.mubr.bf16.gmra.mxu0 %v2392_v60  ;;  %v1219_v36 = vld [vmem:[%s5286_s1 + $0x108] sm:$0xff] }
 0x11b   : > { %v3842_v2 = vpop.eup %3841  ;;  %v2221_v9 = vpack.c.bf16 %v2105_v52, %v2104_v6  ;;  %v1598_v57 = vpop.permute.xlu1 %1597  ;;  %3867 = vpow2.f32 %v3041_v39  ;;  %2484 = vmatprep.mubr.bf16.mxu0 %v2402_v46  ;;  %v2083_v58 = vmul.f32 %v4407_v24, %v1219_v36  ;;  %v2082_v46 = vmul.f32 %v4416_v34, %v1218_v12  ;;  %v2357_v24 = vld [vmem:[%s4220_s14 + $0x2d8] sm:$0xff]  ;;  %v2280_v36 = vld [vmem:[%s4220_s14 + $0x70] sm:$0xff] }
 0x11c   : > { %v3844_v17 = vpop.eup %3843  ;;  %v2103_v1 = vmul.f32 %v1598_v57, %v1239_v11  ;;  %v1593_v40 = vpop.permute.xlu0 %1592  ;;  %1747 = vperm.xlu1 %3332, %v3830_v56   ;;  %v897_v44 = vadd.f32 1.0, %v3842_v2  ;;  %3869 = vpow2.f32 %v3040_v26  ;;  %v2211_v52 = vpack.c.bf16 %v4751_v51, %v2084_v19 }
 0x11d   : > { %v3846_v22 = vpop.eup %3845  ;;  %v2102_v4 = vmul.f32 %v1593_v40, %v1238_v37  ;;  %1742 = vperm.xlu0 %3331, %v3832_v21   ;;  %3115 = vmatprep.subr.bf16.mxu1 %v2221_v9  ;;  %v896_v27 = vadd.f32 1.0, %v3844_v17  ;;  %3871 = vpow2.f32 %v3039_v38  ;;  %v2212_v21 = vpack.c.bf16 %v2087_v29, %v2086_v25  ;;  %v2366_v38 = vld [vmem:[%s4220_s14 + $0x320] sm:$0xff]  ;;  %v1313_v37 = vld [vmem:[%s5286_s1 + $0x3f8] sm:$0xff]  ;;  %v2287_v40 = vld [vmem:[%s4220_s14 + $0xa8] sm:$0xff] }
 0x11e   : > { %v3848_v13 = vpop.eup %3847  ;;  %3116 = vmatpush3.bf16.msra.mxu1 %v2213_v41  ;;  %3873 = vrcp.f32 %v897_v44  ;;  %v895_v5 = vadd.f32 1.0, %v3846_v22  ;;  %v2410_v2 = vpack.c.bf16 %v2347_v53, %v2338_v33  ;;  %v2277_v9 = vld [vmem:[%s4220_s14 + $0x58] sm:$0xff]  ;;  %v2420_v57 = vpack.c.bf16 %v2366_v38, %v2357_v24  ;;  %v2296_v44 = vld [vmem:[%s4220_s14 + $0xf0] sm:$0xff]  ;;  %v1294_v38 = vld [vmem:[%s5286_s1 + $0x360] sm:$0xff] }
 0x11f   : > { %v3850_v50 = vpop.eup %3849  ;;  %v2220_v56 = vpack.c.bf16 %v2103_v1, %v2102_v4  ;;  %v1588_v20 = vpop.permute.xlu1 %1587  ;;  %3875 = vrcp.f32 %v896_v27  ;;  %v894_v32 = vadd.f32 1.0, %v3848_v13  ;;  %v2210_v10 = vpack.c.bf16 %v2083_v58, %v2082_v46  ;;  %v1297_v22 = vld [vmem:[%s5286_s1 + $0x378] sm:$0xff] }
 0x120   : > { %v3852_v15 = vpop.eup %3851  ;;  %v2101_v61 = vmul.f32 %v1588_v20, %v1237_v23  ;;  %v1583_v39 = vpop.permute.xlu0 %1582  ;;  %1667 = vperm.xlu1 %3332, %v4708_v43   ;;  %3877 = vrcp.f32 %v895_v5  ;;  %v893_v26 = vadd.f32 1.0, %v3850_v50  ;;  %v1234_v43 = vld [vmem:[%s5286_s1 + $0x180] sm:$0xff]  ;;  %v1296_v23 = vld [vmem:[%s5286_s1 + $0x370] sm:$0xff]  ;;  %v2386_v5 = vpack.c.bf16 %v2296_v44, %v2287_v40  ;;  %v2365_v50 = vld [vmem:[%s4220_s14 + $0x318] sm:$0xff] }
 0x121   : > { %v3854_v30 = vpop.eup %3853  ;;  %v2100_v60 = vmul.f32 %v1583_v39, %v1236_v28  ;;  %1662 = vperm.xlu0 %3331, %v4717_v47   ;;  %3117 = vmatprep.subr.bf16.mxu1 %v2220_v56  ;;  %3879 = vrcp.f32 %v894_v32  ;;  %v892_v54 = vadd.f32 1.0, %v3852_v15  ;;  %v2271_v15 = vld [vmem:[%s4220_s14 + $0x28] sm:$0xff]  ;;  %v2305_v53 = vld [vmem:[%s4220_s14 + $0x138] sm:$0xff] }
 0x122   : > { %v3856_v55 = vpop.eup %3855  ;;  %3118 = vmatpush3.bf16.msra.mxu1 %v2212_v21  ;;  %3881 = vpow2.f32 %v3038_v49  ;;  %2485 = vmatmul.mubr.bf16.gmra.mxu0 %v2401_v31  ;;  %v891_v11 = vadd.f32 1.0, %v3854_v30  ;;  %v2356_v31 = vld [vmem:[%s4220_s14 + $0x2d0] sm:$0xff]  ;;  %v1310_v30 = vld [vmem:[%s5286_s1 + $0x3e0] sm:$0xff]  ;;  %v2379_v58 = vpack.c.bf16 %v2280_v36, %v2271_v15  ;;  %v2323_v44 = vld [vmem:[%s4220_s14 + $0x1c8] sm:$0xff] }
 0x123   : > { %v3858_v63 = vpop.eup %3857  ;;  %v2219_v47 = vpack.c.bf16 %v2101_v61, %v2100_v60  ;;  %v1578_v48 = vpop.permute.xlu1 %1577  ;;  %3883 = vpow2.f32 %v4739_v42  ;;  %2492 = vmatprep.mubr.bf16.mxu0 %v2411_v14  ;;  %v890_v49 = vadd.f32 1.0, %v3856_v55  ;;  %v1311_v61 = vld [vmem:[%s5286_s1 + $0x3e8] sm:$0xff]  ;;  %v2419_v60 = vpack.c.bf16 %v2365_v50, %v2356_v31 }
 0x124   : > { %v3860_v8 = vpop.eup %3859  ;;  %v2099_v59 = vmul.f32 %v1578_v48, %v1235_v45  ;;  %v1573_v6 = vpop.permute.xlu0 %1572  ;;  %1737 = vperm.xlu1 %3332, %v4726_v62   ;;  %3885 = vrcp.f32 %v893_v26  ;;  %v1312_v62 = vld [vmem:[%s5286_s1 + $0x3f0] sm:$0xff] }
 0x125   : > { %v3862_v34 = vpop.eup %3861  ;;  %v2098_v16 = vmul.f32 %v1573_v6, %v1234_v43  ;;  %1732 = vperm.xlu0 %3331, %v4731_v0   ;;  %3119 = vmatprep.subr.bf16.mxu1 %v2219_v47  ;;  %3887 = vrcp.f32 %v892_v54  ;;  %v2268_v0 = vld [vmem:[%s4220_s14 + $0x10] sm:$0xff]  ;;  %v2286_v43 = vld [vmem:[%s4220_s14 + $0xa0] sm:$0xff]  ;;  %v1295_v6 = vld [vmem:[%s5286_s1 + $0x368] sm:$0xff] }
 0x126   : > { %v3864_v42 = vpop.eup %3863  ;;  %3120 = vmatpush3.bf16.msra.mxu1 %v2211_v52  ;;  %3889 = vrcp.f32 %v891_v11  ;;  %v889_v1 = vadd.f32 1.0, %v3862_v34  ;;  %v2376_v27 = vpack.c.bf16 %v2277_v9, %v2268_v0 }
 0x127   : > { %v3866_v7 = vpop.eup %3865  ;;  %v2218_v29 = vpack.c.bf16 %v2099_v59, %v2098_v16  ;;  %v1968_v25 = vpop.permute.xlu1 %1967  ;;  %3891 = vrcp.f32 %v890_v49  ;;  %v888_v51 = vadd.f32 1.0, %v3864_v42 }
 0x128   : > { %v3868_v35 = vpop.eup %3867  ;;  %v2177_v17 = vmul.f32 %v1968_v25, %v1313_v37  ;;  %v1963_v41 = vpop.permute.xlu0 %1962  ;;  %1657 = vperm.xlu1 %3332, %v3858_v63   ;;  %3893 = vrcp.f32 %v889_v1  ;;  %v887_v14 = vadd.f32 1.0, %v3866_v7  ;;  %v2295_v63 = vld [vmem:[%s4220_s14 + $0xe8] sm:$0xff]  ;;  %v1281_v25 = vld [vmem:[%s5286_s1 + $0x2f8] sm:$0xff] }
 0x129   : > { %v3870_v3 = vpop.eup %3869  ;;  %v2176_v18 = vmul.f32 %v1963_v41, %v1312_v62  ;;  %1652 = vperm.xlu0 %3331, %v3860_v8   ;;  %3121 = vmatprep.subr.bf16.mxu1 %v2218_v29  ;;  %3895 = vrcp.f32 %v888_v51  ;;  %v886_v39 = vadd.f32 1.0, %v3868_v35  ;;  %v2314_v8 = vld [vmem:[%s4220_s14 + $0x180] sm:$0xff]  ;;  %v2385_v34 = vpack.c.bf16 %v2295_v63, %v2286_v43  ;;  %v2313_v41 = vld [vmem:[%s4220_s14 + $0x178] sm:$0xff]  ;;  %v1292_v43 = vld [vmem:[%s5286_s1 + $0x350] sm:$0xff] }
 0x12a   : > { %v3872_v4 = vpop.eup %3871  ;;  %3122 = vmatpush3.bf16.msra.mxu1 %v2210_v10  ;;  %2493 = vmatmul.mubr.bf16.gmra.mxu0 %v2410_v2  ;;  %3897 = vrcp.f32 %v887_v14  ;;  %v885_v33 = vadd.f32 1.0, %v3870_v3  ;;  %v2395_v49 = vpack.c.bf16 %v2314_v8, %v2305_v53  ;;  %v2332_v3 = vld [vmem:[%s4220_s14 + $0x210] sm:$0xff]  ;;  %v1309_v51 = vld [vmem:[%s5286_s1 + $0x3d8] sm:$0xff] }
 0x12b   : > { %v3874_v13 = vpop.eup %3873  ;;  %v2257_v19 = vpack.c.bf16 %v2177_v17, %v2176_v18  ;;  %v1888_v28 = vpop.permute.xlu1 %1887  ;;  %2500 = vmatprep.mubr.bf16.mxu0 %v2420_v57  ;;  %3899 = vrcp.f32 %v886_v39  ;;  %v884_v11 = vadd.f32 1.0, %v3872_v4  ;;  %v1280_v57 = vld [vmem:[%s5286_s1 + $0x2f0] sm:$0xff] }
 0x12c   : > { %v3876_v56 = vpop.eup %3875  ;;  %v2161_v20 = vmul.f32 %v1888_v28, %v1297_v22  ;;  %v1883_v32 = vpop.permute.xlu0 %1882  ;;  %2047 = vperm.xlu1 %3332, %v3874_v13   ;;  %3901 = vrcp.f32 %v885_v33  ;;  %v2304_v17 = vld [vmem:[%s4220_s14 + $0x130] sm:$0xff]  ;;  %v2404_v28 = vpack.c.bf16 %v2332_v3, %v2323_v44  ;;  %v2358_v44 = vld [vmem:[%s4220_s14 + $0x2e0] sm:$0xff]  ;;  %v2367_v3 = vld [vmem:[%s4220_s14 + $0x328] sm:$0xff] }
 0x12d   : > { %v3878_v12 = vpop.eup %3877  ;;  %v2160_v21 = vmul.f32 %v1883_v32, %v1296_v23  ;;  %2042 = vperm.xlu0 %3331, %v3876_v56   ;;  %3211 = vmatprep.subr.bf16.mxu1 %v2257_v19  ;;  %3903 = vrcp.f32 %v884_v11  ;;  %v1308_v23 = vld [vmem:[%s5286_s1 + $0x3d0] sm:$0xff] }
 0x12e   : > { %v3880_v26 = vpop.eup %3879  ;;  %2542 = vmatmul.mubr.bf16.vlgmr.msra.gmra.mxu1 %v2376_v27  ;;  %v2394_v27 = vpack.c.bf16 %v2313_v41, %v2304_v17  ;;  %v1264_v14 = vld [vmem:[%s5286_s1 + $0x270] sm:$0xff]  ;;  %v1263_v17 = vld [vmem:[%s5286_s1 + $0x268] sm:$0xff]  ;;  %v1262_v41 = vld [vmem:[%s5286_s1 + $0x260] sm:$0xff] }
 0x12f   : > { %v3882_v45 = vpop.eup %3881  ;;  %v2249_v54 = vpack.c.bf16 %v2161_v20, %v2160_v21  ;;  %v1958_v55 = vpop.permute.xlu1 %1957  ;;  %2549 = vmatprep.mubr.bf16.mxu1 %v2386_v5  ;;  %v1265_v20 = vld [vmem:[%s5286_s1 + $0x278] sm:$0xff]  ;;  %v2331_v21 = vld [vmem:[%s4220_s14 + $0x208] sm:$0xff] }
 0x130   : > { %v3884_v46 = vpop.eup %3883  ;;  %v2175_v47 = vmul.f32 %v1958_v55, %v1311_v61  ;;  %v1953_v48 = vpop.permute.xlu0 %1952  ;;  %2037 = vperm.xlu1 %3332, %v3878_v12   ;;  %v883_v2 = vadd.f32 1.0, %v3882_v45  ;;  %v2322_v12 = vld [vmem:[%s4220_s14 + $0x1c0] sm:$0xff] }
 0x131   : > { %v3886_v52 = vpop.eup %3885  ;;  %v2174_v59 = vmul.f32 %v1953_v48, %v1310_v30  ;;  %2032 = vperm.xlu0 %3331, %v3880_v26   ;;  %3212 = vmatpush3.bf16.msra.mxu1 %v2249_v54  ;;  %v882_v0 = vadd.f32 1.0, %v3884_v46  ;;  %v2341_v26 = vld [vmem:[%s4220_s14 + $0x258] sm:$0xff]  ;;  %v2350_v30 = vld [vmem:[%s4220_s14 + $0x2a0] sm:$0xff]  ;;  %v2403_v63 = vpack.c.bf16 %v2331_v21, %v2322_v12 }
 0x132   : > { %v3888_v24 = vpop.eup %3887  ;;  %2501 = vmatmul.mubr.bf16.gmra.mxu0 %v2419_v60  ;;  %3905 = vrcp.f32 %v883_v2  ;;  %v1293_v54 = vld [vmem:[%s5286_s1 + $0x358] sm:$0xff]  ;;  %v1307_v2 = vld [vmem:[%s5286_s1 + $0x3c8] sm:$0xff] }
 0x133   : > { %v2256_v16 = vpack.c.bf16 %v2175_v47, %v2174_v59  ;;  %v1878_v37 = vpop.permute.xlu1 %1877  ;;  %2622 = vmatprep.mubr.bf16.mxu0 %v2379_v58  ;;  %v3890_v7 = vpop.eup %3889  ;;  %3907 = vrcp.f32 %v882_v0  ;;  %v2413_v47 = vpack.c.bf16 %v2350_v30, %v2341_v26  ;;  %v1304_v26 = vld [vmem:[%s5286_s1 + $0x3b0] sm:$0xff] }
 0x134   : > { %v2159_v42 = vmul.f32 %v1878_v37, %v1295_v6  ;;  %v1873_v62 = vpop.permute.xlu0 %1872  ;;  %2027 = vperm.xlu1 %3332, %v3886_v52   ;;  %v3892_v9 = vpop.eup %3891  ;;  %v1279_v52 = vld [vmem:[%s5286_s1 + $0x2e8] sm:$0xff]  ;;  %v1278_v6 = vld [vmem:[%s5286_s1 + $0x2e0] sm:$0xff] }
 0x135   : > { %v2158_v29 = vmul.f32 %v1873_v62, %v1294_v38  ;;  %2022 = vperm.xlu0 %3331, %v3888_v24   ;;  %3213 = vmatprep.subr.bf16.mxu1 %v2256_v16  ;;  %v3894_v18 = vpop.eup %3893  ;;  %v2340_v38 = vld [vmem:[%s4220_s14 + $0x250] sm:$0xff] }
 0x136   : > { %2550 = vmatmul.mubr.bf16.gmra.mxu1 %v2385_v34  ;;  %v3896_v4 = vpop.eup %3895  ;;  %v2349_v34 = vld [vmem:[%s4220_s14 + $0x298] sm:$0xff] }
 0x137   : > { %v2248_v35 = vpack.c.bf16 %v2159_v42, %v2158_v29  ;;  %v1808_v10 = vpop.permute.xlu1 %1807  ;;  %2557 = vmatprep.mubr.bf16.mxu1 %v2395_v49  ;;  %v3898_v50 = vpop.eup %3897  ;;  %v2359_v49 = vld [vmem:[%s4220_s14 + $0x2e8] sm:$0xff]  ;;  %v2368_v42 = vld [vmem:[%s4220_s14 + $0x330] sm:$0xff]  ;;  %v2412_v29 = vpack.c.bf16 %v2349_v34, %v2340_v38  ;;  %v1274_v34 = vld [vmem:[%s5286_s1 + $0x2c0] sm:$0xff] }
 0x138   : > { %v2145_v1 = vmul.f32 %v1808_v10, %v1281_v25  ;;  %v1803_v40 = vpop.permute.xlu0 %1802  ;;  %2017 = vperm.xlu1 %3332, %v3890_v7   ;;  %v3900_v32 = vpop.eup %3899  ;;  %v1306_v7 = vld [vmem:[%s5286_s1 + $0x3c0] sm:$0xff]  ;;  %v1275_v38 = vld [vmem:[%s5286_s1 + $0x2c8] sm:$0xff] }
 0x139   : > { %v2144_v22 = vmul.f32 %v1803_v40, %v1280_v57  ;;  %2012 = vperm.xlu0 %3331, %v3892_v9   ;;  %3214 = vmatpush3.bf16.msra.mxu1 %v2248_v35  ;;  %v3902_v60 = vpop.eup %3901  ;;  %v2422_v9 = vpack.c.bf16 %v2368_v42, %v2359_v49 }
 0x13a   : > { %v3904_v55 = vpop.eup %3903 }
 0x13b   : > { %v2241_v13 = vpack.c.bf16 %v2145_v1, %v2144_v22  ;;  %v1948_v19 = vpop.permute.xlu1 %1947 }
 0x13c   : > { %v2173_v5 = vmul.f32 %v1948_v19, %v1309_v51  ;;  %v1943_v31 = vpop.permute.xlu0 %1942  ;;  %2007 = vperm.xlu1 %3332, %v3894_v18   ;;  %v2273_v51 = vld [vmem:[%s4220_s14 + $0x38] sm:$0xff]  ;;  %v2421_v19 = vpack.c.bf16 %v2367_v3, %v2358_v44  ;;  %v1287_v3 = vld [vmem:[%s5286_s1 + $0x328] sm:$0xff] }
 0x13d   : > { %v2172_v56 = vmul.f32 %v1943_v31, %v1308_v23  ;;  %2002 = vperm.xlu0 %3331, %v3896_v4   ;;  %3159 = vmatprep.subr.bf16.mxu0 %v2241_v13  ;;  %v2282_v4 = vld [vmem:[%s4220_s14 + $0x80] sm:$0xff] }
 0x13e   : > { %2558 = vmatmul.mubr.bf16.gmra.mxu1 %v2394_v27  ;;  %v1291_v27 = vld [vmem:[%s5286_s1 + $0x348] sm:$0xff]  ;;  %v1290_v13 = vld [vmem:[%s5286_s1 + $0x340] sm:$0xff]  ;;  %v2381_v31 = vpack.c.bf16 %v2282_v4, %v2273_v51 }
 0x13f   : > { %v2255_v15 = vpack.c.bf16 %v2173_v5, %v2172_v56  ;;  %v1728_v36 = vpop.permute.xlu1 %1727  ;;  %2565 = vmatprep.mubr.bf16.mxu1 %v2404_v28  ;;  %v3906_v53 = vpop.eup %3905 }
 0x140   : > { %v2129_v61 = vmul.f32 %v1728_v36, %v1265_v20  ;;  %v1723_v39 = vpop.permute.xlu0 %1722  ;;  %1997 = vperm.xlu1 %3332, %v3898_v50   ;;  %v3908_v59 = vpop.eup %3907 }
 0x141   : > { %v2128_v45 = vmul.f32 %v1723_v39, %v1264_v14  ;;  %1992 = vperm.xlu0 %3331, %v3900_v32   ;;  %3215 = vmatprep.subr.bf16.mxu1 %v2255_v15  ;;  %v1277_v32 = vld [vmem:[%s5286_s1 + $0x2d8] sm:$0xff]  ;;  %v1276_v14 = vld [vmem:[%s5286_s1 + $0x2d0] sm:$0xff] }
 0x142   : > { %v1305_v39 = vld [vmem:[%s5286_s1 + $0x3b8] sm:$0xff] }
 0x143   : > { %v2233_v58 = vpack.c.bf16 %v2129_v61, %v2128_v45  ;;  %v1868_v46 = vpop.permute.xlu1 %1867 }
 0x144   : > { %v2157_v48 = vmul.f32 %v1868_v46, %v1293_v54  ;;  %v1863_v33 = vpop.permute.xlu0 %1862  ;;  %1987 = vperm.xlu1 %3332, %v3902_v60  }
 0x145   : > { %v2156_v8 = vmul.f32 %v1863_v33, %v1292_v43  ;;  %1982 = vperm.xlu0 %3331, %v3904_v55   ;;  %3160 = vmatpush3.bf16.msra.mxu0 %v2233_v58  ;;  %v1261_v43 = vld [vmem:[%s5286_s1 + $0x258] sm:$0xff] }
 0x146   : > { %2566 = vmatmul.mubr.bf16.gmra.mxu1 %v2403_v63  ;;  %v1260_v63 = vld [vmem:[%s5286_s1 + $0x250] sm:$0xff] }
 0x147   : > { %v2247_v11 = vpack.c.bf16 %v2157_v48, %v2156_v8  ;;  %v1798_v24 = vpop.permute.xlu1 %1797  ;;  %2573 = vmatprep.mubr.bf16.mxu1 %v2413_v47  ;;  %v1288_v8 = vld [vmem:[%s5286_s1 + $0x330] sm:$0xff] }
 0x148   : > { %v2143_v16 = vmul.f32 %v1798_v24, %v1279_v52  ;;  %v1793_v37 = vpop.permute.xlu0 %1792  ;;  %1977 = vperm.xlu1 %3332, %v3906_v53   ;;  %v1289_v53 = vld [vmem:[%s5286_s1 + $0x338] sm:$0xff] }
 0x149   : > { %v2142_v62 = vmul.f32 %v1793_v37, %v1278_v6  ;;  %1972 = vperm.xlu0 %3331, %v3908_v59   ;;  %3216 = vmatpush3.bf16.msra.mxu1 %v2247_v11 }
 0x14b   : > { %v2240_v25 = vpack.c.bf16 %v2143_v16, %v2142_v62  ;;  %v1938_v0 = vpop.permute.xlu1 %1937 }
 0x14c   : > { %v2171_v57 = vmul.f32 %v1938_v0, %v1307_v2  ;;  %v1933_v35 = vpop.permute.xlu0 %1932  ;;  %v1303_v2 = vld [vmem:[%s5286_s1 + $0x3a8] sm:$0xff] }
 0x14d   : > { %v2170_v10 = vmul.f32 %v1933_v35, %v1306_v7  ;;  %3161 = vmatprep.subr.bf16.mxu0 %v2240_v25  ;;  %v1302_v7 = vld [vmem:[%s5286_s1 + $0x3a0] sm:$0xff]  ;;  %v1259_v35 = vld [vmem:[%s5286_s1 + $0x248] sm:$0xff] }
 0x14e   : > { %2574 = vmatmul.mubr.bf16.gmra.mxu1 %v2412_v29 }
 0x14f   : > { %v2254_v1 = vpack.c.bf16 %v2171_v57, %v2170_v10  ;;  %v1718_v40 = vpop.permute.xlu1 %1717  ;;  %2581 = vmatprep.mubr.bf16.mxu1 %v2422_v9  ;;  %v1258_v10 = vld [vmem:[%s5286_s1 + $0x240] sm:$0xff] }
 0x150   : > { %v2127_v18 = vmul.f32 %v1718_v40, %v1263_v17  ;;  %v1713_v22 = vpop.permute.xlu0 %1712 }
 0x151   : > { %v2126_v23 = vmul.f32 %v1713_v22, %v1262_v41  ;;  %3217 = vmatprep.subr.bf16.mxu1 %v2254_v1 }
 0x153   : > { %v2232_v28 = vpack.c.bf16 %v2127_v18, %v2126_v23  ;;  %v1858_v5 = vpop.permute.xlu1 %1857  ;;  %v1286_v18 = vld [vmem:[%s5286_s1 + $0x320] sm:$0xff] }
 0x154   : > { %v2155_v50 = vmul.f32 %v1858_v5, %v1291_v27  ;;  %v1853_v56 = vpop.permute.xlu0 %1852 }
 0x155   : > { %v2154_v20 = vmul.f32 %v1853_v56, %v1290_v13  ;;  %3162 = vmatpush3.bf16.msra.mxu0 %v2232_v28  ;;  %v1273_v13 = vld [vmem:[%s5286_s1 + $0x2b8] sm:$0xff] }
 0x156   : > { %2582 = vmatmul.mubr.bf16.gmra.mxu1 %v2421_v19  ;;  %v1272_v19 = vld [vmem:[%s5286_s1 + $0x2b0] sm:$0xff] }
 0x157   : > { %v2246_v15 = vpack.c.bf16 %v2155_v50, %v2154_v20  ;;  %v1788_v36 = vpop.permute.xlu1 %1787  ;;  %2703 = vmatprep.mubr.bf16.mxu1 %v2381_v31  ;;  %v1301_v20 = vld [vmem:[%s5286_s1 + $0x398] sm:$0xff] }
 0x158   : > { %v2141_v12 = vmul.f32 %v1788_v36, %v1277_v32  ;;  %v1783_v21 = vpop.permute.xlu0 %1782  ;;  %v1300_v32 = vld [vmem:[%s5286_s1 + $0x390] sm:$0xff] }
 0x159   : > { %v2140_v61 = vmul.f32 %v1783_v21, %v1276_v14  ;;  %3218 = vmatpush3.bf16.msra.mxu1 %v2246_v15 }
 0x15b   : > { %v2239_v30 = vpack.c.bf16 %v2141_v12, %v2140_v61  ;;  %v1928_v60 = vpop.permute.xlu1 %1927  ;;  %v1257_v61 = vld [vmem:[%s5286_s1 + $0x238] sm:$0xff] }
 0x15c   : > { %v2169_v45 = vmul.f32 %v1928_v60, %v1305_v39  ;;  %v1923_v54 = vpop.permute.xlu0 %1922  ;;  %v1256_v39 = vld [vmem:[%s5286_s1 + $0x230] sm:$0xff] }
 0x15d   : > { %v2168_v55 = vmul.f32 %v1923_v54, %v1304_v26  ;;  %3163 = vmatprep.subr.bf16.mxu0 %v2239_v30 }
 0x15f   : > { %v2253_v58 = vpack.c.bf16 %v2169_v45, %v2168_v55  ;;  %v1708_v46 = vpop.permute.xlu1 %1707  ;;  %v1285_v55 = vld [vmem:[%s5286_s1 + $0x318] sm:$0xff] }
 0x160   : > { %v2125_v47 = vmul.f32 %v1708_v46, %v1261_v43  ;;  %v1703_v48 = vpop.permute.xlu0 %1702  ;;  %v1284_v43 = vld [vmem:[%s5286_s1 + $0x310] sm:$0xff] }
 0x161   : > { %v2124_v33 = vmul.f32 %v1703_v48, %v1260_v63  ;;  %3219 = vmatprep.subr.bf16.mxu1 %v2253_v58 }
 0x163   : > { %v2231_v52 = vpack.c.bf16 %v2125_v47, %v2124_v33  ;;  %v1848_v59 = vpop.permute.xlu1 %1847  ;;  %v1271_v33 = vld [vmem:[%s5286_s1 + $0x2a8] sm:$0xff] }
 0x164   : > { %v2153_v6 = vmul.f32 %v1848_v59, %v1289_v53  ;;  %v1843_v11 = vpop.permute.xlu0 %1842  ;;  %v1270_v53 = vld [vmem:[%s5286_s1 + $0x2a0] sm:$0xff] }
 0x165   : > { %v2152_v24 = vmul.f32 %v1843_v11, %v1288_v8  ;;  %3164 = vmatpush3.bf16.msra.mxu0 %v2231_v52 }
 0x167   : > { %v2245_v16 = vpack.c.bf16 %v2153_v6, %v2152_v24  ;;  %v1778_v37 = vpop.permute.xlu1 %1777  ;;  %v1299_v24 = vld [vmem:[%s5286_s1 + $0x388] sm:$0xff] }
 0x168   : > { %v2139_v49 = vmul.f32 %v1778_v37, %v1275_v38  ;;  %v1773_v42 = vpop.permute.xlu0 %1772  ;;  %v1298_v38 = vld [vmem:[%s5286_s1 + $0x380] sm:$0xff] }
 0x169   : > { %v2138_v62 = vmul.f32 %v1773_v42, %v1274_v34  ;;  %3220 = vmatpush3.bf16.msra.mxu1 %v2245_v16 }
 0x16b   : > { %v2238_v29 = vpack.c.bf16 %v2139_v49, %v2138_v62  ;;  %v1918_v25 = vpop.permute.xlu1 %1917  ;;  %v1255_v62 = vld [vmem:[%s5286_s1 + $0x228] sm:$0xff] }
 0x16c   : > { %v2167_v0 = vmul.f32 %v1918_v25, %v1303_v2  ;;  %v1913_v9 = vpop.permute.xlu0 %1912  ;;  %v1254_v2 = vld [vmem:[%s5286_s1 + $0x220] sm:$0xff] }
 0x16d   : > { %v2166_v57 = vmul.f32 %v1913_v9, %v1302_v7  ;;  %3165 = vmatprep.subr.bf16.mxu0 %v2238_v29 }
 0x16f   : > { %v2252_v17 = vpack.c.bf16 %v2167_v0, %v2166_v57  ;;  %v1698_v41 = vpop.permute.xlu1 %1697  ;;  %v1283_v57 = vld [vmem:[%s5286_s1 + $0x308] sm:$0xff] }
 0x170   : > { %v2123_v1 = vmul.f32 %v1698_v41, %v1259_v35  ;;  %v1693_v40 = vpop.permute.xlu0 %1692  ;;  %v1282_v35 = vld [vmem:[%s5286_s1 + $0x300] sm:$0xff] }
 0x171   : > { %v2122_v44 = vmul.f32 %v1693_v40, %v1258_v10  ;;  %3221 = vmatprep.subr.bf16.mxu1 %v2252_v17 }
 0x173   : > { %v2230_v22 = vpack.c.bf16 %v2123_v1, %v2122_v44  ;;  %v1838_v51 = vpop.permute.xlu1 %1837  ;;  %v1269_v44 = vld [vmem:[%s5286_s1 + $0x298] sm:$0xff] }
 0x174   : > { %v2151_v4 = vmul.f32 %v1838_v51, %v1287_v3  ;;  %v1833_v23 = vpop.permute.xlu0 %1832  ;;  %v2272_v3 = vld [vmem:[%s4220_s14 + $0x30] sm:$0xff]  ;;  %v2291_v51 = vld [vmem:[%s4220_s14 + $0xc8] sm:$0xff] }
 0x175   : > { %v2150_v27 = vmul.f32 %v1833_v23, %v1286_v18  ;;  %3166 = vmatpush3.bf16.msra.mxu0 %v2230_v22  ;;  %v2281_v18 = vld [vmem:[%s4220_s14 + $0x78] sm:$0xff]  ;;  %v1268_v22 = vld [vmem:[%s5286_s1 + $0x290] sm:$0xff] }
 0x177   : > { %v2244_v28 = vpack.c.bf16 %v2151_v4, %v2150_v27  ;;  %v1768_v5 = vpop.permute.xlu1 %1767  ;;  %v2300_v4 = vld [vmem:[%s4220_s14 + $0x110] sm:$0xff] }
 0x178   : > { %v2137_v31 = vmul.f32 %v1768_v5, %v1273_v13  ;;  %v1763_v50 = vpop.permute.xlu0 %1762 }
 0x179   : > { %v2136_v56 = vmul.f32 %v1763_v50, %v1272_v19  ;;  %3222 = vmatpush3.bf16.msra.mxu1 %v2244_v28  ;;  %v2380_v28 = vpack.c.bf16 %v2281_v18, %v2272_v3  ;;  %v2390_v50 = vpack.c.bf16 %v2300_v4, %v2291_v51  ;;  %v1325_v3 = vld [vmem:[%s5286_s1 + $0x458] sm:$0xff]  ;;  %v2288_v18 = vld [vmem:[%s4220_s14 + $0xb0] sm:$0xff]  ;;  %v2326_v4 = vld [vmem:[%s4220_s14 + $0x1e0] sm:$0xff] }
 0x17a   : > { %v2297_v51 = vld [vmem:[%s4220_s14 + $0xf8] sm:$0xff] }
 0x17b   : > { %v2237_v14 = vpack.c.bf16 %v2137_v31, %v2136_v56  ;;  %v1908_v15 = vpop.permute.xlu1 %1907  ;;  %v1253_v31 = vld [vmem:[%s5286_s1 + $0x218] sm:$0xff]  ;;  %v1252_v56 = vld [vmem:[%s5286_s1 + $0x210] sm:$0xff] }
 0x17c   : > { %v2165_v36 = vmul.f32 %v1908_v15, %v1301_v20  ;;  %v1903_v12 = vpop.permute.xlu0 %1902 }
 0x17d   : > { %v2164_v21 = vmul.f32 %v1903_v12, %v1300_v32  ;;  %3167 = vmatprep.subr.bf16.mxu0 %v2237_v14  ;;  %v1267_v12 = vld [vmem:[%s5286_s1 + $0x288] sm:$0xff] }
 0x17f   : > { %v2251_v26 = vpack.c.bf16 %v2165_v36, %v2164_v21  ;;  %v1688_v30 = vpop.permute.xlu1 %1687  ;;  %v2290_v21 = vld [vmem:[%s4220_s14 + $0xc0] sm:$0xff] }
 0x180   : > { %v2121_v60 = vmul.f32 %v1688_v30, %v1257_v61  ;;  %v1683_v45 = vpop.permute.xlu0 %1682  ;;  %v2299_v61 = vld [vmem:[%s4220_s14 + $0x108] sm:$0xff]  ;;  %v2318_v30 = vld [vmem:[%s4220_s14 + $0x1a0] sm:$0xff] }
 0x181   : > { %v2120_v54 = vmul.f32 %v1683_v45, %v1256_v39  ;;  %3223 = vmatprep.subr.bf16.mxu1 %v2251_v26  ;;  %v1266_v39 = vld [vmem:[%s5286_s1 + $0x280] sm:$0xff]  ;;  %v2309_v26 = vld [vmem:[%s4220_s14 + $0x158] sm:$0xff] }
 0x183   : > { %v2229_v63 = vpack.c.bf16 %v2121_v60, %v2120_v54  ;;  %v1828_v58 = vpop.permute.xlu1 %1827 }
 0x184   : > { %v2149_v46 = vmul.f32 %v1828_v58, %v1285_v55  ;;  %v1823_v47 = vpop.permute.xlu0 %1822  ;;  %v1251_v58 = vld [vmem:[%s5286_s1 + $0x208] sm:$0xff] }
 0x185   : > { %v2148_v48 = vmul.f32 %v1823_v47, %v1284_v43  ;;  %3168 = vmatpush3.bf16.msra.mxu0 %v2229_v63  ;;  %v2389_v43 = vpack.c.bf16 %v2299_v61, %v2290_v21  ;;  %v1250_v47 = vld [vmem:[%s5286_s1 + $0x200] sm:$0xff] }
 0x187   : > { %v2243_v8 = vpack.c.bf16 %v2149_v46, %v2148_v48  ;;  %v1758_v52 = vpop.permute.xlu1 %1757  ;;  %v2399_v46 = vpack.c.bf16 %v2318_v30, %v2309_v26 }
 0x188   : > { %v2135_v59 = vmul.f32 %v1758_v52, %v1271_v33  ;;  %v1753_v6 = vpop.permute.xlu0 %1752  ;;  %v1329_v52 = vld [vmem:[%s5286_s1 + $0x478] sm:$0xff] }
 0x189   : > { %v2134_v11 = vmul.f32 %v1753_v6, %v1270_v53  ;;  %3224 = vmatpush3.bf16.msra.mxu1 %v2243_v8 }
 0x18b   : > { %v2236_v34 = vpack.c.bf16 %v2135_v59, %v2134_v11  ;;  %v1898_v16 = vpop.permute.xlu1 %1897  ;;  %v2270_v59 = vld [vmem:[%s4220_s14 + $0x20] sm:$0xff]  ;;  %v2279_v11 = vld [vmem:[%s4220_s14 + $0x68] sm:$0xff] }
 0x18c   : > { %v2163_v37 = vmul.f32 %v1898_v16, %v1299_v24  ;;  %v1893_v49 = vpop.permute.xlu0 %1892  ;;  %v2308_v24 = vld [vmem:[%s4220_s14 + $0x150] sm:$0xff] }
 0x18d   : > { %v2162_v42 = vmul.f32 %v1893_v49, %v1298_v38  ;;  %3169 = vmatprep.subr.bf16.mxu0 %v2236_v34  ;;  %v2317_v38 = vld [vmem:[%s4220_s14 + $0x198] sm:$0xff]  ;;  %v1328_v34 = vld [vmem:[%s5286_s1 + $0x470] sm:$0xff] }
 0x18e   : > { %v2289_v49 = vld [vmem:[%s4220_s14 + $0xb8] sm:$0xff] }
 0x18f   : > { %v2250_v7 = vpack.c.bf16 %v2163_v37, %v2162_v42  ;;  %v1678_v29 = vpop.permute.xlu1 %1677 }
 0x190   : > { %v2119_v25 = vmul.f32 %v1678_v29, %v1255_v62  ;;  %v1673_v0 = vpop.permute.xlu0 %1672  ;;  %v2298_v29 = vld [vmem:[%s4220_s14 + $0x100] sm:$0xff] }
 0x191   : > { %v2118_v9 = vmul.f32 %v1673_v0, %v1254_v2  ;;  %3225 = vmatprep.subr.bf16.mxu1 %v2250_v7  ;;  %v2378_v2 = vpack.c.bf16 %v2279_v11, %v2270_v59  ;;  %v2398_v7 = vpack.c.bf16 %v2317_v38, %v2308_v24  ;;  %v2336_v0 = vld [vmem:[%s4220_s14 + $0x230] sm:$0xff]  ;;  %v2363_v11 = vld [vmem:[%s4220_s14 + $0x308] sm:$0xff] }
 0x192   : > { %v2372_v24 = vld [vmem:[%s4220_s14 + $0x350] sm:$0xff] }
 0x193   : > { %v2228_v10 = vpack.c.bf16 %v2119_v25, %v2118_v9  ;;  %v1818_v17 = vpop.permute.xlu1 %1817  ;;  %v2327_v25 = vld [vmem:[%s4220_s14 + $0x1e8] sm:$0xff] }
 0x194   : > { %v2147_v41 = vmul.f32 %v1818_v17, %v1283_v57  ;;  %v1813_v1 = vpop.permute.xlu0 %1812  ;;  %v1327_v57 = vld [vmem:[%s5286_s1 + $0x468] sm:$0xff] }
 0x195   : > { %v2146_v40 = vmul.f32 %v1813_v1, %v1282_v35  ;;  %3170 = vmatpush3.bf16.msra.mxu0 %v2228_v10  ;;  %v1326_v35 = vld [vmem:[%s5286_s1 + $0x460] sm:$0xff]  ;;  %v2408_v1 = vpack.c.bf16 %v2336_v0, %v2327_v25  ;;  %v2324_v25 = vld [vmem:[%s4220_s14 + $0x1d0] sm:$0xff] }
 0x197   : > { %v2242_v23 = vpack.c.bf16 %v2147_v41, %v2146_v40  ;;  %v1748_v27 = vpop.permute.xlu1 %1747  ;;  %v2388_v41 = vpack.c.bf16 %v2298_v29, %v2289_v49  ;;  %v1317_v29 = vld [vmem:[%s5286_s1 + $0x418] sm:$0xff] }
 0x198   : > { %v2133_v13 = vmul.f32 %v1748_v27, %v1269_v44  ;;  %v1743_v19 = vpop.permute.xlu0 %1742  ;;  %v1324_v27 = vld [vmem:[%s5286_s1 + $0x450] sm:$0xff] }
 0x199   : > { %v2132_v5 = vmul.f32 %v1743_v19, %v1268_v22  ;;  %3226 = vmatpush3.bf16.msra.mxu1 %v2242_v23  ;;  %v2335_v23 = vld [vmem:[%s4220_s14 + $0x228] sm:$0xff] }
 0x19b   : > { %v2235_v20 = vpack.c.bf16 %v2133_v13, %v2132_v5  ;;  %v1668_v32 = vpop.permute.xlu1 %1667 }
 0x19c   : > { %v2117_v14 = vmul.f32 %v1668_v32, %v1253_v31  ;;  %v1663_v15 = vpop.permute.xlu0 %1662  ;;  %2704 = vmatmul.mubr.bf16.vlgmr.msra.gmra.mxu1 %v2380_v28  ;;  %v2307_v28 = vld [vmem:[%s4220_s14 + $0x148] sm:$0xff]  ;;  %v2345_v32 = vld [vmem:[%s4220_s14 + $0x278] sm:$0xff] }
 0x19d   : > { %v2116_v36 = vmul.f32 %v1663_v15, %v1252_v56  ;;  %3171 = vmatprep.subr.bf16.mxu0 %v2235_v20  ;;  %2711 = vmatprep.mubr.bf16.mxu1 %v2390_v50  ;;  %v2387_v50 = vpack.c.bf16 %v2297_v51, %v2288_v18  ;;  %v2407_v56 = vpack.c.bf16 %v2335_v23, %v2326_v4  ;;  %v2316_v20 = vld [vmem:[%s4220_s14 + $0x190] sm:$0xff]  ;;  %v2310_v51 = vld [vmem:[%s4220_s14 + $0x160] sm:$0xff]  ;;  %v2319_v4 = vld [vmem:[%s4220_s14 + $0x1a8] sm:$0xff] }
 0x19f   : > { %v2227_v60 = vpack.c.bf16 %v2117_v14, %v2116_v36  ;;  %v1738_v45 = vpop.permute.xlu1 %1737  ;;  %v2354_v14 = vld [vmem:[%s4220_s14 + $0x2c0] sm:$0xff]  ;;  %v1323_v36 = vld [vmem:[%s5286_s1 + $0x448] sm:$0xff] }
 0x1a0   : > { %v2131_v54 = vmul.f32 %v1738_v45, %v1267_v12  ;;  %v1733_v55 = vpop.permute.xlu0 %1732  ;;  %v1322_v12 = vld [vmem:[%s5286_s1 + $0x440] sm:$0xff]  ;;  %v2417_v26 = vpack.c.bf16 %v2354_v14, %v2345_v32  ;;  %v1321_v45 = vld [vmem:[%s5286_s1 + $0x438] sm:$0xff]  ;;  %v2351_v14 = vld [vmem:[%s4220_s14 + $0x2a8] sm:$0xff] }
 0x1a1   : > { %v2130_v63 = vmul.f32 %v1733_v55, %v1266_v39  ;;  %3172 = vmatpush3.bf16.msra.mxu0 %v2227_v60  ;;  %v2397_v39 = vpack.c.bf16 %v2316_v20, %v2307_v28  ;;  %v2342_v32 = vld [vmem:[%s4220_s14 + $0x260] sm:$0xff] }
 0x1a3   : > { %v2234_v48 = vpack.c.bf16 %v2131_v54, %v2130_v63  ;;  %v1658_v33 = vpop.permute.xlu1 %1657  ;;  %v2306_v54 = vld [vmem:[%s4220_s14 + $0x140] sm:$0xff]  ;;  %v2344_v63 = vld [vmem:[%s4220_s14 + $0x270] sm:$0xff] }
 0x1a4   : > { %v2115_v53 = vmul.f32 %v1658_v33, %v1251_v58  ;;  %v1653_v8 = vpop.permute.xlu0 %1652  ;;  %2712 = vmatmul.mubr.bf16.gmra.mxu1 %v2389_v43  ;;  %v2315_v43 = vld [vmem:[%s4220_s14 + $0x188] sm:$0xff]  ;;  %v2353_v58 = vld [vmem:[%s4220_s14 + $0x2b8] sm:$0xff] }
 0x1a5   : > { %v2114_v6 = vmul.f32 %v1653_v8, %v1250_v47  ;;  %3173 = vmatprep.subr.bf16.mxu0 %v2234_v48  ;;  %2719 = vmatprep.mubr.bf16.mxu1 %v2399_v46  ;;  %v1320_v46 = vld [vmem:[%s5286_s1 + $0x430] sm:$0xff]  ;;  %v2325_v33 = vld [vmem:[%s4220_s14 + $0x1d8] sm:$0xff]  ;;  %v2416_v59 = vpack.c.bf16 %v2353_v58, %v2344_v63 }
 0x1a6   : > { %v2360_v63 = vld [vmem:[%s4220_s14 + $0x2f0] sm:$0xff]  ;;  %v2369_v58 = vld [vmem:[%s4220_s14 + $0x338] sm:$0xff] }
 0x1a7   : > { %v2226_v16 = vpack.c.bf16 %v2115_v53, %v2114_v6  ;;  %v2048_v37 = vpop.permute.xlu1 %2047  ;;  %v2334_v6 = vld [vmem:[%s4220_s14 + $0x220] sm:$0xff] }
 0x1a8   : > { %v2193_v42 = vmul.f32 %v2048_v37, %v1329_v52  ;;  %v2043_v62 = vpop.permute.xlu0 %2042  ;;  %v2396_v52 = vpack.c.bf16 %v2315_v43, %v2306_v54 }
 0x1a9   : > { %v2192_v9 = vmul.f32 %v2043_v62, %v1328_v34  ;;  %3174 = vmatpush3.bf16.msra.mxu0 %v2226_v16  ;;  %v1319_v34 = vld [vmem:[%s5286_s1 + $0x428] sm:$0xff]  ;;  %v1318_v16 = vld [vmem:[%s5286_s1 + $0x420] sm:$0xff]  ;;  %v2426_v62 = vpack.c.bf16 %v2372_v24, %v2363_v11 }
 0x1ab   : > { %v2265_v10 = vpack.c.bf16 %v2193_v42, %v2192_v9  ;;  %v2038_v17 = vpop.permute.xlu1 %2037  ;;  %v2406_v42 = vpack.c.bf16 %v2334_v6, %v2325_v33  ;;  %v2333_v9 = vld [vmem:[%s4220_s14 + $0x218] sm:$0xff]  ;;  %v2274_v33 = vld [vmem:[%s4220_s14 + $0x40] sm:$0xff] }
 0x1ac   : > { %v2191_v40 = vmul.f32 %v2038_v17, %v1327_v57  ;;  %v2033_v44 = vpop.permute.xlu0 %2032  ;;  %2623 = vmatmul.mubr.bf16.vlgmr.msra.gmra.mxu0 %v2378_v2  ;;  %2720 = vmatmul.mubr.bf16.gmra.mxu1 %v2398_v7  ;;  %v2362_v57 = vld [vmem:[%s4220_s14 + $0x300] sm:$0xff] }
 0x1ad   : > { %v2190_v22 = vmul.f32 %v2033_v44, %v1326_v35  ;;  %3277 = vmatprep.subr.bf16.mxu0 %v2265_v10  ;;  %3305 = vmatprep.subr.bf16.mxu1 %v2265_v10  ;;  %v2371_v35 = vld [vmem:[%s4220_s14 + $0x348] sm:$0xff] }
 0x1ae   : > { %3278 = vmatpush3.bf16.msra.mxu0 %v2265_v10  ;;  %3313 = vmatpush3.bf16.msra.mxu1 %v2265_v10  ;;  %v1316_v10 = vld [vmem:[%s5286_s1 + $0x410] sm:$0xff]  ;;  %v2425_v18 = vpack.c.bf16 %v2371_v35, %v2362_v57 }
 0x1af   : > { %v2264_v13 = vpack.c.bf16 %v2191_v40, %v2190_v22  ;;  %v2028_v19 = vpop.permute.xlu1 %2027  ;;  %2630 = vmatprep.mubr.bf16.mxu0 %v2388_v41  ;;  %2727 = vmatprep.mubr.bf16.mxu1 %v2408_v1  ;;  %v2343_v1 = vld [vmem:[%s4220_s14 + $0x268] sm:$0xff]  ;;  %v2352_v22 = vld [vmem:[%s4220_s14 + $0x2b0] sm:$0xff] }
 0x1b0   : > { %v2189_v5 = vmul.f32 %v2028_v19, %v1325_v3  ;;  %v2023_v31 = vpop.permute.xlu0 %2022  ;;  %v2405_v3 = vpack.c.bf16 %v2333_v9, %v2324_v25 }
 0x1b1   : > { %v2188_v15 = vmul.f32 %v2023_v31, %v1324_v27  ;;  %3279 = vmatprep.subr.bf16.mxu0 %v2264_v13  ;;  %3306 = vmatprep.subr.bf16.mxu1 %v2264_v13  ;;  %v1315_v27 = vld [vmem:[%s5286_s1 + $0x408] sm:$0xff]  ;;  %v2400_v31 = vpack.c.bf16 %v2319_v4, %v2310_v51 }
 0x1b2   : > { %3280 = vmatpush3.bf16.msra.mxu0 %v2264_v13  ;;  %3314 = vmatpush3.bf16.msra.mxu1 %v2264_v13  ;;  %v1314_v13 = vld [vmem:[%s5286_s1 + $0x400] sm:$0xff] }
 0x1b3   : > { %v2263_v21 = vpack.c.bf16 %v2189_v5, %v2188_v15  ;;  %v2018_v61 = vpop.permute.xlu1 %2017  ;;  %v2415_v5 = vpack.c.bf16 %v2352_v22, %v2343_v1  ;;  %v2328_v15 = vld [vmem:[%s4220_s14 + $0x1f0] sm:$0xff] }
 0x1b4   : > { %v2187_v30 = vmul.f32 %v2018_v61, %v1323_v36  ;;  %v2013_v60 = vpop.permute.xlu0 %2012  ;;  %2631 = vmatmul.mubr.bf16.gmra.mxu0 %v2387_v50  ;;  %2728 = vmatmul.mubr.bf16.gmra.mxu1 %v2407_v56  ;;  %v2337_v36 = vld [vmem:[%s4220_s14 + $0x238] sm:$0xff] }
 0x1b5   : > { %v2186_v55 = vmul.f32 %v2013_v60, %v1322_v12  ;;  %3281 = vmatprep.subr.bf16.mxu0 %v2263_v21  ;;  %3307 = vmatprep.subr.bf16.mxu1 %v2263_v21  ;;  %v2361_v12 = vld [vmem:[%s4220_s14 + $0x2f8] sm:$0xff]  ;;  %v2409_v60 = vpack.c.bf16 %v2337_v36, %v2328_v15 }
 0x1b6   : > { %3282 = vmatpush3.bf16.msra.mxu0 %v2263_v21  ;;  %3315 = vmatpush3.bf16.msra.mxu1 %v2263_v21  ;;  %v2370_v21 = vld [vmem:[%s4220_s14 + $0x340] sm:$0xff] }
 0x1b7   : > { %v2262_v47 = vpack.c.bf16 %v2187_v30, %v2186_v55  ;;  %v2008_v48 = vpop.permute.xlu1 %2007  ;;  %2638 = vmatprep.mubr.bf16.mxu0 %v2397_v39  ;;  %2735 = vmatprep.mubr.bf16.mxu1 %v2417_v26  ;;  %v2346_v39 = vld [vmem:[%s4220_s14 + $0x280] sm:$0xff]  ;;  %v2355_v26 = vld [vmem:[%s4220_s14 + $0x2c8] sm:$0xff]  ;;  %v2414_v30 = vpack.c.bf16 %v2351_v14, %v2342_v32 }
 0x1b8   : > { %v2185_v53 = vmul.f32 %v2008_v48, %v1321_v45  ;;  %v2003_v8 = vpop.permute.xlu0 %2002  ;;  %v2424_v45 = vpack.c.bf16 %v2370_v21, %v2361_v12  ;;  %v2418_v54 = vpack.c.bf16 %v2355_v26, %v2346_v39  ;;  %v2373_v48 = vld [vmem:[%s4220_s14 + $0x358] sm:$0xff] }
 0x1b9   : > { %v2184_v38 = vmul.f32 %v2003_v8, %v1320_v46  ;;  %3283 = vmatprep.subr.bf16.mxu0 %v2262_v47  ;;  %3308 = vmatprep.subr.bf16.mxu1 %v2262_v47  ;;  %v2364_v46 = vld [vmem:[%s4220_s14 + $0x310] sm:$0xff] }
 0x1ba   : > { %3284 = vmatpush3.bf16.msra.mxu0 %v2262_v47  ;;  %3316 = vmatpush3.bf16.msra.mxu1 %v2262_v47  ;;  %v2427_v6 = vpack.c.bf16 %v2373_v48, %v2364_v46 }
 0x1bb   : > { %v2261_v37 = vpack.c.bf16 %v2185_v53, %v2184_v38  ;;  %v1998_v49 = vpop.permute.xlu1 %1997  ;;  %v2283_v53 = vld [vmem:[%s4220_s14 + $0x88] sm:$0xff] }
 0x1bc   : > { %v2183_v2 = vmul.f32 %v1998_v49, %v1319_v34  ;;  %v1993_v7 = vpop.permute.xlu0 %1992  ;;  %2639 = vmatmul.mubr.bf16.gmra.mxu0 %v2396_v52  ;;  %2736 = vmatmul.mubr.bf16.gmra.mxu1 %v2416_v59  ;;  %v2423_v52 = vpack.c.bf16 %v2369_v58, %v2360_v63  ;;  %v2382_v11 = vpack.c.bf16 %v2283_v53, %v2274_v33 }
 0x1bd   : > { %v2182_v0 = vmul.f32 %v1993_v7, %v1318_v16  ;;  %3285 = vmatprep.subr.bf16.mxu0 %v2261_v37  ;;  %3309 = vmatprep.subr.bf16.mxu1 %v2261_v37  ;;  %v2292_v16 = vld [vmem:[%s4220_s14 + $0xd0] sm:$0xff] }
 0x1be   : > { %3286 = vmatpush3.bf16.msra.mxu0 %v2261_v37  ;;  %3317 = vmatpush3.bf16.msra.mxu1 %v2261_v37  ;;  %v2301_v37 = vld [vmem:[%s4220_s14 + $0x118] sm:$0xff]  ;;  %s2908_s14 = sshll.u32 %s5320_s24, 3 }
 0x1bf   : > { %v2260_v17 = vpack.c.bf16 %v2183_v2, %v2182_v0  ;;  %v1988_v41 = vpop.permute.xlu1 %1987  ;;  %2646 = vmatprep.mubr.bf16.mxu0 %v2406_v42  ;;  %2743 = vmatprep.mubr.bf16.mxu1 %v2426_v62  ;;  %v2391_v62 = vpack.c.bf16 %v2301_v37, %v2292_v16  ;;  %s5215_s10 = scalar_lea.vmem %s5288_s3, %s2908_s14 }
 0x1c0   : > { %v2181_v40 = vmul.f32 %v1988_v41, %v1317_v29  ;;  %v1983_v44 = vpop.permute.xlu0 %1982 }
 0x1c1   : > { %v2180_v23 = vmul.f32 %v1983_v44, %v1316_v10  ;;  %3287 = vmatprep.subr.bf16.mxu0 %v2260_v17  ;;  %3310 = vmatprep.subr.bf16.mxu1 %v2260_v17 }
 0x1c2   : > { %3288 = vmatpush3.bf16.msra.mxu0 %v2260_v17  ;;  %3318 = vmatpush3.bf16.msra.mxu1 %v2260_v17 }
 0x1c3   : > { %v2259_v19 = vpack.c.bf16 %v2181_v40, %v2180_v23  ;;  %v1978_v28 = vpop.permute.xlu1 %1977 }
 0x1c4   : > { %v2179_v50 = vmul.f32 %v1978_v28, %v1315_v27  ;;  %v1973_v56 = vpop.permute.xlu0 %1972  ;;  %2647 = vmatmul.mubr.bf16.gmra.mxu0 %v2405_v3  ;;  %2744 = vmatmul.mubr.bf16.gmra.mxu1 %v2425_v18 }
 0x1c5   : > { %v2178_v20 = vmul.f32 %v1973_v56, %v1314_v13  ;;  %3289 = vmatprep.subr.bf16.mxu0 %v2259_v19  ;;  %3311 = vmatprep.subr.bf16.mxu1 %v2259_v19 }
 0x1c6   : > { %3290 = vmatpush3.bf16.msra.mxu0 %v2259_v19  ;;  %3319 = vmatpush3.bf16.msra.mxu1 %v2259_v19 }
 0x1c7   : > { %v2258_v61 = vpack.c.bf16 %v2179_v50, %v2178_v20  ;;  %2654 = vmatprep.mubr.bf16.mxu0 %v2415_v5  ;;  %3297 = vmatprep.mubr.bf16.mxu1 %v2400_v31 }
 0x1c9   : > { %3291 = vmatprep.subr.bf16.mxu0 %v2258_v61  ;;  %3312 = vmatprep.subr.bf16.mxu1 %v2258_v61 }
 0x1ca   : > { %3292 = vmatpush3.bf16.msra.mxu0 %v2258_v61  ;;  %3320 = vmatpush3.bf16.msra.mxu1 %v2258_v61  ;;  %v3071_v55 = vpop.f32.mrf.mxu0 }
 0x1cc   : > { %2655 = vmatmul.mubr.bf16.gmra.mxu0 %v2414_v30  ;;  %v3072_v43 = vpop.f32.mrf.mxu0 }
 0x1cd   : > { %3298 = vmatmul.mubr.bf16.vlgmr.msra.gmra.mxu1 %v2409_v60  ;;  %2662 = vmatprep.mubr.bf16.mxu0 %v2424_v45  ;;  %v3073_v47 = vadd.f32 %v3072_v43, %v3071_v55 }
 0x1ce   : > { %3301 = vmatprep.mubr.bf16.mxu1 %v2418_v54  ;;  %v3074_v8 = vpop.f32.mrf.mxu0 }
 0x1d0   : > { %v3075_v59 = vpop.f32.mrf.mxu0 }
 0x1d1   : > { %v3076_v24 = vadd.f32 %v3075_v59, %v3074_v8 }
 0x1d2   : > { %v3077_v38 = vpop.f32.mrf.mxu0 }
 0x1d4   : > { %2663 = vmatmul.mubr.bf16.gmra.mxu0 %v2423_v52  ;;  %v3078_v34 = vpop.f32.mrf.mxu0 }
 0x1d5   : > { %3302 = vmatmul.mubr.bf16.gmra.mxu1 %v2427_v6  ;;  %3293 = vmatprep.mubr.bf16.mxu0 %v2382_v11  ;;  %v3079_v49 = vadd.f32 %v3078_v34, %v3077_v38 }
 0x1d6   : > { %v3080_v42 = vpop.f32.mrf.mxu0 }
 0x1d8   : > { %v3081_v2 = vpop.f32.mrf.mxu0 }
 0x1d9   : > { %v3082_v7 = vadd.f32 %v3081_v2, %v3080_v42 }
 0x1da   : > { %v3083_v21 = vpop.f32.mrf.mxu0 }
 0x1dc   : > { %3294 = vmatmul.mubr.bf16.vlgmr.msra.gmra.mxu0 %v2391_v62  ;;  %v3084_v61 = vpop.f32.mrf.mxu0 }
 0x1de   : > { %v5128_v39 = vpop.f32.mrf.mxu0 }
 0x1e0   : > { %v3087_v26 = vpop.f32.mrf.mxu0 }
 0x1e2   : > { %v3089_v30 = vpop.f32.mrf.mxu0 }
 0x1e4   : > { %v3090_v60 = vpop.f32.mrf.mxu0 }
 0x1e6   : > { %v3092_v45 = vpop.f32.mrf.mxu0 }
 0x1e8   : > { %v3093_v54 = vpop.f32.mrf.mxu0 }
 0x1ea   : > { %v5132_v43 = vpop.f32.mrf.mxu0 }
 0x1ec   : > { %v5136_v58 = vpop.f32.mrf.mxu0 }
 0x1ee   : > { %v3123_v29 = vpop.f32.mrf.mxu1 }
 0x1f0   : > { %v3124_v25 = vpop.f32.mrf.mxu1 }
 0x1f1   : > { %v3125_v0 = vadd.f32 %v3124_v25, %v3123_v29 }
 0x1f2   : > { %v3126_v9 = vpop.f32.mrf.mxu1 }
 0x1f3   : > { %v5108_v57 = vadd.f32 %v3125_v0, %v3073_v47  ;;  %v5140_v47 = vpop.f32.mrf.mxu0 }
 0x1f4   : > { %v3127_v35 = vpop.f32.mrf.mxu1 }
 0x1f5   : > { %v3128_v10 = vadd.f32 %v3127_v35, %v3126_v9  ;;  %v5144_v33 = vpop.f32.mrf.mxu0 }
 0x1f6   : > { %v3129_v17 = vpop.f32.mrf.mxu1 }
 0x1f7   : > { %v5110_v41 = vadd.f32 %v3128_v10, %v3076_v24  ;;  %v5150_v52 = vpop.f32.mrf.mxu0 }
 0x1f8   : > { %v3130_v1 = vpop.f32.mrf.mxu1 }
 0x1f9   : > { %5289 = vst [vmem:[#allocation2_spill] sm:$0xff] %v5110_v41  ;;  %v3131_v40 = vadd.f32 %v3130_v1, %v3129_v17  ;;  %v5154_v6 = vpop.f32.mrf.mxu0  ;;  %v3085_v41 = vadd.f32 %v3084_v61, %v3083_v21 }
 0x1fa   : > { %v3132_v44 = vpop.f32.mrf.mxu1 }
 0x1fb   : > { %v5112_v3 = vadd.f32 %v3131_v40, %v3079_v49  ;;  %v5160_v38 = vpop.f32.mrf.mxu0 }
 0x1fc   : > { %v3133_v18 = vpop.f32.mrf.mxu1 }
 0x1fd   : > { %v3134_v22 = vadd.f32 %v3133_v18, %v3132_v44  ;;  %v5166_v37 = vpop.f32.mrf.mxu0 }
 0x1fe   : > { %v3135_v51 = vpop.f32.mrf.mxu1 }
 0x1ff   : > { %v5114_v4 = vadd.f32 %v3134_v22, %v3082_v7 }
 0x200   : > { %v3136_v23 = vpop.f32.mrf.mxu1 }
 0x201   : > { %5290 = vst [vmem:[#allocation3_spill] sm:$0xff] %v5114_v4  ;;  %v5116_v27 = vadd.f32 %v3136_v23, %v3135_v51 }
 0x202   : > { %v3138_v13 = vpop.f32.mrf.mxu1 }
 0x204   : > { %v3139_v19 = vpop.f32.mrf.mxu1 }
 0x205   : > { %v5118_v28 = vadd.f32 %v3139_v19, %v3138_v13 }
 0x206   : > { %v3141_v5 = vpop.f32.mrf.mxu1 }
 0x208   : > { %v3142_v31 = vpop.f32.mrf.mxu1 }
 0x20a   : > { %v5120_v50 = vpop.f32.mrf.mxu1 }
 0x20c   : > { %v5122_v56 = vpop.f32.mrf.mxu1 }
 0x20e   : > { %v3147_v20 = vpop.f32.mrf.mxu1 }
 0x210   : > { %v3148_v32 = vpop.f32.mrf.mxu1 }
 0x211   : > { %v5124_v14 = vadd.f32 %v3148_v32, %v3147_v20 }
 0x212   : > { %v3150_v15 = vpop.f32.mrf.mxu1 }
 0x214   : > { %v3151_v36 = vpop.f32.mrf.mxu1 }
 0x215   : > { %v5126_v12 = vadd.f32 %v3151_v36, %v3150_v15 }
 0x216   : > { %v5130_v55 = vpop.f32.mrf.mxu1 }
 0x218   : > { %v5134_v63 = vpop.f32.mrf.mxu1 }
 0x21a   : > { %v5138_v46 = vpop.f32.mrf.mxu1 }
 0x21c   : > { %v5142_v48 = vpop.f32.mrf.mxu1 }
 0x25c   : > { %v5146_v53 = vpop.f32.mrf.mxu1 }
 0x25d   : > { %5291 = vst [vmem:[#allocation4_spill] sm:$0xff] %v5146_v53 }
 0x25e   : > { %v5148_v8 = vpop.f32.mrf.mxu1 }
 0x25f   : > { %5292 = vst [vmem:[#allocation5_spill] sm:$0xff] %v5148_v8 }
 0x260   : > { %v5152_v59 = vpop.f32.mrf.mxu1 }
 0x261   : > { %5293 = vst [vmem:[#allocation6_spill] sm:$0xff] %v5152_v59  ;;  %v3091_v59 = vadd.f32 %v3090_v60, %v3089_v30 }
 0x262   : > { %v5156_v11 = vpop.f32.mrf.mxu1 }
 0x263   : > { %5294 = vst [vmem:[#allocation7_spill] sm:$0xff] %v5156_v11  ;;  %v3143_v11 = vadd.f32 %v3142_v31, %v3141_v5  ;;  %v3088_v5 = vadd.f32 %v3087_v26, %v5128_v39 }
 0x264   : > { %v5158_v24 = vpop.f32.mrf.mxu1 }
 0x265   : > { %5295 = vst [vmem:[#allocation8_spill] sm:$0xff] %v5158_v24  ;;  %v2568_v24 = vadd.f32 %v3143_v11, %v3091_v59 }
 0x266   : > { %v5162_v34 = vpop.f32.mrf.mxu1 }
 0x267   : > { %5296 = vst [vmem:[#allocation9_spill] sm:$0xff] %v5162_v34  ;;  %v3146_v34 = vadd.f32 %v5122_v56, %v5120_v50 }
 0x268   : > { %v5164_v16 = vpop.f32.mrf.mxu1 }
 0x269   : > { %5297 = vst [vmem:[#allocation10_spill] sm:$0xff] %v5164_v16 }
 0x26a   : > { %v5168_v49 = vpop.f32.mrf.mxu1 }
 0x26b   : > { %5298 = vst [vmem:[#allocation11_spill] sm:$0xff] %v5168_v49 }
 0x26c   : > { %v5170_v42 = vpop.f32.mrf.mxu0  ;;  %v3239_v62 = vpop.f32.mrf.mxu1 }
 0x26e   : > { %v5172_v2 = vpop.f32.mrf.mxu0  ;;  %v3240_v7 = vpop.f32.mrf.mxu1 }
 0x270   : > { %v5174_v29 = vpop.f32.mrf.mxu0  ;;  %v5176_v25 = vpop.f32.mrf.mxu1 }
 0x271   : > { %5299 = vst [vmem:[#allocation12_spill] sm:$0xff] %v5174_v29  ;;  %v2560_v29 = vadd.f32 %v5116_v27, %v3085_v41  ;;  %v3097_v41 = vadd.f32 %v5136_v58, %v5132_v43  ;;  %v3241_v27 = vadd.f32 %v3240_v7, %v3239_v62 }
 0x272   : > { %v5178_v0 = vpop.f32.mrf.mxu0  ;;  %v3243_v9 = vpop.f32.mrf.mxu1 }
 0x273   : > { %5300 = vst [vmem:[#allocation13_spill] sm:$0xff] %v5178_v0  ;;  %v3094_v0 = vadd.f32 %v3093_v54, %v3092_v45  ;;  %v2563_v45 = vadd.f32 %v5118_v28, %v3088_v5  ;;  %v2576_v58 = vadd.f32 %v5124_v14, %v3097_v41  ;;  %v3155_v14 = vadd.f32 %v5134_v63, %v5130_v55 }
 0x274   : > { %v5180_v35 = vpop.f32.mrf.mxu0  ;;  %v3245_v10 = vpop.f32.mrf.mxu1 }
 0x276   : > { %v5182_v17 = vpop.f32.mrf.mxu0  ;;  %v3246_v1 = vpop.f32.mrf.mxu1 }
 0x277   : > { %v3247_v61 = vadd.f32 %v3246_v1, %v3245_v10 }
 0x278   : > { %v5184_v40 = vpop.f32.mrf.mxu0  ;;  %v3248_v44 = vpop.f32.mrf.mxu1 }
 0x27a   : > { %v5186_v18 = vpop.f32.mrf.mxu0  ;;  %v3249_v22 = vpop.f32.mrf.mxu1 }
 0x27b   : > { %v3250_v26 = vadd.f32 %v3249_v22, %v3248_v44 }
 0x27c   : > { %v3187_v51 = vpop.f32.mrf.mxu0  ;;  %v5188_v23 = vpop.f32.mrf.mxu1 }
 0x27e   : > { %v3188_v13 = vpop.f32.mrf.mxu0  ;;  %v5190_v19 = vpop.f32.mrf.mxu1 }
 0x27f   : > { %v3189_v4 = vadd.f32 %v3188_v13, %v3187_v51 }
 0x280   : > { %v3190_v20 = vpop.f32.mrf.mxu0  ;;  %v5192_v32 = vpop.f32.mrf.mxu1 }
 0x281   : > { %5301 = vst [vmem:[#allocation14_spill] sm:$0xff] %v5192_v32  ;;  %v2641_v60 = vadd.f32 %v3189_v4, %v2560_v29 }
 0x282   : > { %v3191_v15 = vpop.f32.mrf.mxu0  ;;  %v5194_v36 = vpop.f32.mrf.mxu1 }
 0x283   : > { %v3192_v51 = vadd.f32 %v3191_v15, %v3190_v20  ;;  %v2722_v28 = vadd.f32 %v3241_v27, %v2641_v60  ;;  %v3177_v20 = vadd.f32 %v5172_v2, %v5170_v42  ;;  %v5312_v27 = vld [vmem:[#allocation5_spill] sm:$0xff] }
 0x284   : > { %v3193_v49 = vpop.f32.mrf.mxu0  ;;  %v5196_v16 = vpop.f32.mrf.mxu1 }
 0x285   : > { %5302 = vst [vmem:[#allocation15_spill] sm:$0xff] %v5196_v16 }
 0x286   : > { %v3194_v8 = vpop.f32.mrf.mxu0  ;;  %v5198_v53 = vpop.f32.mrf.mxu1 }
 0x287   : > { %5303 = vst [vmem:[#allocation16_spill] sm:$0xff] %v5198_v53  ;;  %v3195_v32 = vadd.f32 %v3194_v8, %v3193_v49  ;;  %v2571_v53 = vadd.f32 %v3146_v34, %v3094_v0  ;;  %v2644_v8 = vadd.f32 %v3192_v51, %v2563_v45  ;;  %v3244_v49 = vadd.f32 %v3243_v9, %v5176_v25  ;;  %v5307_v51 = vld [vmem:[#allocation8_spill] sm:$0xff] }
 0x288   : > { %v3196_v31 = vpop.f32.mrf.mxu0  ;;  %v5204_v21 = vpop.f32.mrf.mxu1 }
 0x289   : > { %v2649_v30 = vadd.f32 %v3195_v32, %v2568_v24  ;;  %v2725_v44 = vadd.f32 %v3244_v49, %v2644_v8  ;;  %v3253_v32 = vadd.f32 %v5190_v19, %v5188_v23  ;;  %v3186_v23 = vadd.f32 %v5186_v18, %v5184_v40  ;;  %v5311_v18 = vld [vmem:[#allocation4_spill] sm:$0xff] }
 0x28a   : > { %v3197_v13 = vpop.f32.mrf.mxu0  ;;  %v5206_v16 = vpop.f32.mrf.mxu1 }
 0x28b   : > { %v3198_v50 = vadd.f32 %v3197_v13, %v3196_v31  ;;  %v2730_v56 = vadd.f32 %v3247_v61, %v2649_v30  ;;  %v2625_v31 = vadd.f32 %v3177_v20, %v5108_v57  ;;  %v5308_v13 = vld [vmem:[#allocation9_spill] sm:$0xff] }
 0x28c   : > { %v3199_v39 = vpop.f32.mrf.mxu0 }
 0x28d   : > { %v2652_v54 = vadd.f32 %v3198_v50, %v2571_v53  ;;  %v3299_v4 = vpop.f32.mrf.mxu1  ;;  %v3100_v53 = vadd.f32 %v5144_v33, %v5140_v47  ;;  %v3103_v47 = vadd.f32 %v5154_v6, %v5150_v52  ;;  %v3183_v33 = vadd.f32 %v5182_v17, %v5180_v35 }
 0x28e   : > { %v2811_v59 = vadd.f32 %v3299_v4, %v2730_v56  ;;  %v3200_v11 = vpop.f32.mrf.mxu0  ;;  %v3158_v52 = vadd.f32 %v5142_v48, %v5138_v46  ;;  %v3106_v6 = vadd.f32 %v5166_v37, %v5160_v38  ;;  %v5304_v46 = vld [vmem:[#allocation12_spill] sm:$0xff]  ;;  %v5305_v48 = vld [vmem:[#allocation13_spill] sm:$0xff]  ;;  %v5306_v38 = vld [vmem:[#allocation14_spill] sm:$0xff]  ;;  %v3235_v50 = vadd.f32 %v5308_v13, %v5307_v51 }
 0x28f   : > { %v3201_v24 = vadd.f32 %v3200_v11, %v3199_v39  ;;  %v2802_v34 = vpop.f32.mrf.mxu1  ;;  %v2733_v43 = vadd.f32 %v3250_v26, %v2652_v54  ;;  %v2579_v22 = vadd.f32 %v5126_v12, %v3100_v53  ;;  %v2584_v42 = vadd.f32 %v3155_v14, %v3103_v47  ;;  %v5309_v56 = vld [vmem:[#allocation15_spill] sm:$0xff]  ;;  %v5317_v14 = vld [vmem:[#allocation6_spill] sm:$0xff] }
 0x290   : > { %2840 = vst.msk [vmem:[%s5215_s10 + $0x30] sm:$0xff] %vm2833_vm0, %v2811_v59  ;;  %v2803_v62 = vadd.f32 %v2802_v34, %v2722_v28  ;;  %v3202_v7 = vpop.f32.mrf.mxu0  ;;  %v2633_v2 = vadd.f32 %v3183_v33, %v5112_v3  ;;  %v3180_v61 = vadd.f32 %v5305_v48, %v5304_v46  ;;  %v3256_v37 = vadd.f32 %v5194_v36, %v5306_v38  ;;  %v5310_v3 = vld [vmem:[#allocation16_spill] sm:$0xff]  ;;  %v5313_v36 = vld [vmem:[#allocation3_spill] sm:$0xff] }
 0x291   : > { %v3300_v29 = vpop.f32.mrf.mxu1  ;;  %v2657_v0 = vadd.f32 %v3201_v24, %v2576_v58  ;;  %v3259_v45 = vadd.f32 %v5310_v3, %v5309_v56  ;;  %v3229_v39 = vadd.f32 %v5312_v27, %v5311_v18  ;;  %v2587_v57 = vadd.f32 %v3158_v52, %v3106_v6  ;;  %v5314_v24 = vld [vmem:[#allocation10_spill] sm:$0xff]  ;;  %v5315_v34 = vld [vmem:[#allocation11_spill] sm:$0xff] }
 0x292   : > { %2838 = vst.msk [vmem:[%s5215_s10 + $0x20] sm:$0xff] %vm2833_vm0, %v2803_v62  ;;  %v2814_v10 = vadd.f32 %v3300_v29, %v2733_v43  ;;  %v3203_v1 = vpop.f32.mrf.mxu0  ;;  %v2636_v4 = vadd.f32 %v3186_v23, %v5313_v36  ;;  %v2714_v28 = vadd.f32 %v3235_v50, %v2633_v2  ;;  %v3238_v43 = vadd.f32 %v5315_v34, %v5314_v24  ;;  %v5316_v58 = vld [vmem:[#allocation2_spill] sm:$0xff]  ;;  %v5318_v47 = vld [vmem:[#allocation7_spill] sm:$0xff] }
 0x293   : > { %v3204_v25 = vadd.f32 %v3203_v1, %v3202_v7  ;;  %v2805_v9 = vpop.f32.mrf.mxu1  ;;  %v2738_v17 = vadd.f32 %v3253_v32, %v2657_v0  ;;  %v2628_v53 = vadd.f32 %v3180_v61, %v5316_v58  ;;  %v2706_v7 = vadd.f32 %v3229_v39, %v2625_v31 }
 0x294   : > { %2841 = vst.msk [vmem:[%s5215_s10 + $0x38] sm:$0xff] %vm2833_vm0, %v2814_v10  ;;  %v2806_v15 = vadd.f32 %v2805_v9, %v2725_v44  ;;  %v3205_v55 = vpop.f32.mrf.mxu0  ;;  %v3262_v29 = vadd.f32 %v5206_v16, %v5204_v21  ;;  %v3232_v33 = vadd.f32 %v5318_v47, %v5317_v14 }
 0x295   : > { %v3303_v63 = vpop.f32.mrf.mxu1  ;;  %v2660_v35 = vadd.f32 %v3204_v25, %v2579_v22  ;;  %v2717_v22 = vadd.f32 %v3238_v43, %v2636_v4 }
 0x296   : > { %2839 = vst.msk [vmem:[%s5215_s10 + $0x28] sm:$0xff] %vm2833_vm0, %v2806_v15  ;;  %v3206_v12 = vpop.f32.mrf.mxu0  ;;  %v2709_v32 = vadd.f32 %v3232_v33, %v2628_v53 }
 0x297   : > { %v3207_v19 = vadd.f32 %v3206_v12, %v3205_v55  ;;  %v2818_v5 = vpop.f32.mrf.mxu1  ;;  %v2741_v54 = vadd.f32 %v3256_v37, %v2660_v35 }
 0x298   : > { %v2819_v30 = vadd.f32 %v2818_v5, %v2738_v17  ;;  %v3208_v60 = vpop.f32.mrf.mxu0 }
 0x299   : > { %v2665_v41 = vadd.f32 %v3207_v19, %v2584_v42  ;;  %v3304_v40 = vpop.f32.mrf.mxu1 }
 0x29a   : > { %2842 = vst.msk [vmem:[%s5215_s10 + $0x40] sm:$0xff] %vm2833_vm0, %v2819_v30  ;;  %v3209_v26 = vpop.f32.mrf.mxu0 }
 0x29b   : > { %v2746_v8 = vadd.f32 %v3259_v45, %v2665_v41  ;;  %v3210_v59 = vadd.f32 %v3209_v26, %v3208_v60  ;;  %v2821_v11 = vpop.f32.mrf.mxu1 }
 0x29c   : > { %v2822_v49 = vadd.f32 %v2821_v11, %v2741_v54  ;;  %v3295_v62 = vpop.f32.mrf.mxu0 }
 0x29d   : > { %v2827_v0 = vadd.f32 %v3303_v63, %v2746_v8  ;;  %v2668_v10 = vadd.f32 %v3210_v59, %v2587_v57  ;;  %v2795_v1 = vadd.f32 %v3295_v62, %v2714_v28 }
 0x29e   : > { %2843 = vst.msk [vmem:[%s5215_s10 + $0x48] sm:$0xff] %vm2833_vm0, %v2822_v49  ;;  %v2786_v44 = vpop.f32.mrf.mxu0 }
 0x29f   : > { %2844 = vst.msk [vmem:[%s5215_s10 + $0x50] sm:$0xff] %vm2833_vm0, %v2827_v0  ;;  %v2749_v25 = vadd.f32 %v3262_v29, %v2668_v10  ;;  %2836 = vst.msk [vmem:[%s5215_s10 + $0x10] sm:$0xff] %vm2833_vm0, %v2795_v1  ;;  %v2787_v9 = vadd.f32 %v2786_v44, %v2706_v7 }
 0x2a0   : > { %v3296_v16 = vpop.f32.mrf.mxu0 }
 0x2a1   : > { %v2830_v21 = vadd.f32 %v3304_v40, %v2749_v25  ;;  %2834 = vst.msk [vmem:[%s5215_s10] sm:$0xff] %vm2833_vm0, %v2787_v9  ;;  %v2798_v20 = vadd.f32 %v3296_v16, %v2717_v22 }
 0x2a2   : > { %v2789_v15 = vpop.f32.mrf.mxu0 }
 0x2a3   : > { %2845 = vst.msk [vmem:[%s5215_s10 + $0x58] sm:$0xff] %vm2833_vm0, %v2830_v21  ;;  %2837 = vst.msk [vmem:[%s5215_s10 + $0x18] sm:$0xff] %vm2833_vm0, %v2798_v20  ;;  %v2790_v55 = vadd.f32 %v2789_v15, %v2709_v32 }
 0x2a5   : > { %2835 = vst.msk [vmem:[%s5215_s10 + $0x8] sm:$0xff] %vm2833_vm0, %v2790_v55 }
 0x2a6 PF: > { %s13_s12 = sadd.s32 1, %s3915_s12  }
 0x2a7   : > { %p10_p4 = scmp.ge.s32.totalorder %s13_s12, 4  }
 0x2a9   :  { %12 = sbr.rel (!%p10_p4) target bundleno = 1 (0x1), region = 62 }

</bundles_post_ra>
